<compile_context>
chip_gen: v5e
topology: v5e:2x2
jax: 0.10.0
libtpu: 0.0.40
codegen_flags: <defaults>
</compile_context>

<pallas_src>
import functools

import jax
import jax.numpy as jnp
from jax import lax
from jax.experimental import pallas as pl
from jax.experimental.pallas import tpu as pltpu  # noqa: F401  (TPU backend import)

C = 256      # channels produced by conv1 and conv2
K = 3        # kernel size of both convs
EPS = 1e-5   # nn.BatchNorm1d default eps

# Row layout of the packed (16, 256) per-channel parameter slab.
_ROW_W1 = 0      # rows 0..2 : conv1 weight taps
_ROW_B1 = 3      # conv1 bias
_ROW_A1 = 4      # prelu1 alpha
_ROW_G1 = 5      # batch1 gamma
_ROW_BB1 = 6     # batch1 beta
_ROW_A2 = 7      # prelu2 alpha
_ROW_G2 = 8      # batch2 gamma
_ROW_BB2 = 9     # batch2 beta
_ROW_B2 = 10     # conv2 bias
_NUM_ROWS = 16   # padded to a multiple of 8 sublanes


def _resblock_kernel(xin_ref, vecs_ref, w2_ref, out_ref, *, n, l, t1, dilation):
    """Fused ResBlock forward; everything resident in VMEM (shapes are tiny).

    Ref shapes (channels-last):
      xin_ref : (N, L, 1)      original input, channel dim trailing
      vecs_ref: (16, 256) f32  packed per-channel params (see _ROW_* above)
      w2_ref  : (3, 256, 256)  bf16 conv2 weight laid out as (tap, in_ch, out_ch)
      out_ref : (N, L, 256)    channels-last f32 output
    """
    xin = xin_ref[...]                       # (N, L, 1)
    vecs = vecs_ref[...]                     # (16, C)

    def row(r):                              # (1, 1, C) broadcastable per-channel row
        return vecs[r][None, None, :]

    # One lane broadcast of the input, reused by the conv1 taps AND the residual add
    # (previously four separate 1->256 broadcasts were emitted).
    xin_b = jnp.broadcast_to(xin, (n, l, C))                 # (N, L, C)

    # ---- conv1 (1 -> 256, kernel 3, dilation d): 3 VPU broadcast FMAs, no MXU.
    x = xin_b[:, 0:t1, :] * row(_ROW_W1)
    for k in range(1, K):
        x = x + xin_b[:, k * dilation: k * dilation + t1, :] * row(_ROW_W1 + k)
    x = x + row(_ROW_B1)                     # (N, T1, C)

    # ---- PReLU(256) #1
    x = jnp.where(x >= 0.0, x, row(_ROW_A1) * x)

    # ---- BatchNorm1d(256), training-mode batch statistics, fused single-pass stats.
    inv_cnt = 1.0 / float(n * t1)

    def sum01(v):                            # sum over (batch, position), keep channel
        return jnp.sum(jnp.sum(v, axis=1, keepdims=True), axis=0, keepdims=True)

    def batchnorm(v, g_row, b_row):
        s = sum01(v)                         # two independent reduction chains,
        sq = sum01(v * v)                    # issued concurrently
        mu = s * inv_cnt
        var = sq * inv_cnt - mu * mu         # E[x^2] - mean^2 (fine at this tolerance)
        scale = lax.rsqrt(var + EPS) * row(g_row)
        return (v - mu) * scale + row(b_row)

    x = batchnorm(x, _ROW_G1, _ROW_BB1)

    # TODO(synk): original `torch.cat(x, 1)` discards its result (and would raise
    # in torch); it is a no-op and intentionally omitted here.

    # ---- PReLU(256) #2
    x = jnp.where(x >= 0.0, x, row(_ROW_A2) * x)

    # ---- BatchNorm1d(256) #2
    x = batchnorm(x, _ROW_G2, _ROW_BB2)

    # ---- conv2 (256 -> 256, kernel 3, valid): output length is 1 (T1 == K).
    #      Three per-tap (N, 256) @ (256, 256) MXU matmuls — no sublane->lane concat.
    #      bf16 operands, f32 accumulation.
    xb = x.astype(jnp.bfloat16)                               # (N, T1, C)
    acc = jnp.dot(xb[:, 0, :], w2_ref[0], preferred_element_type=jnp.float32)
    for t in range(1, t1):
        acc = acc + jnp.dot(xb[:, t, :], w2_ref[t], preferred_element_type=jnp.float32)
    acc = acc + vecs[_ROW_B2][None, :]                        # (N, C)

    # ---- residual broadcast add: (N,1,256) + (N,L,256) -> (N,L,256), lane-dense store.
    out_ref[...] = acc[:, None, :] + xin_b


def prepare_params(params):
    """One-time parameter re-layout (hoisted out of the per-call forward path)."""
    w1 = jnp.transpose(params["w1"][:, 0, :], (1, 0))        # (K, C): [tap, out_ch]
    rows = jnp.stack(
        [w1[0], w1[1], w1[2],
         params["b1"], params["a1"], params["g1"], params["bb1"],
         params["a2"], params["g2"], params["bb2"], params["b2"]],
        axis=0).astype(jnp.float32)                          # (11, C)
    vecs = jnp.zeros((_NUM_ROWS, C), jnp.float32).at[:rows.shape[0]].set(rows)
    # conv2 weight (out_ch, in_ch, tap) -> (tap, in_ch, out_ch); stored bf16 to halve the
    # dominant HBM->VMEM DMA (MXU consumes bf16 natively, accumulation stays f32).
    w2 = jnp.transpose(params["w2"], (2, 1, 0)).astype(jnp.bfloat16)   # (K, C, C)
    return {"vecs": vecs, "w2": w2}


def resblock_forward(x_ncl, prep, dilation):
    """Pallas ResBlock forward. x_ncl: (N, 1, L) f32 -> (N, 256, L) f32."""
    n, cin, l = x_ncl.shape
    assert cin == 1, "conv1 has in_channels=1"
    t1 = l - dilation * (K - 1)          # conv1 output length
    assert t1 == K, ("the residual add in the reference module only broadcasts "
                     "when conv2's output length == 1 (L == 2*dilation + 3)")

    xin3 = jnp.transpose(x_ncl, (0, 2, 1))                   # (N, L, 1), channels-last

    # Advisory cost estimate so XLA can overlap neighbors around this tiny call.
    flops = 2 * n * K * C * C + 14 * n * t1 * C
    bytes_accessed = (n * l * 4) + (_NUM_ROWS * C * 4) + (K * C * C * 2) + (n * l * C * 4)

    out_nlc = pl.pallas_call(
        functools.partial(_resblock_kernel, n=n, l=l, t1=t1, dilation=dilation),
        out_shape=jax.ShapeDtypeStruct((n, l, C), jnp.float32),
        cost_estimate=pl.CostEstimate(flops=flops, transcendentals=2 * C,
                                      bytes_accessed=bytes_accessed),
    )(xin3, prep["vecs"], prep["w2"])

    # Kernel output is kept channels-last (lane-dense 256-wide stores); this transpose
    # only serves the PyTorch NCW interface — delete it if downstream consumes NLC.
    return jnp.transpose(out_nlc, (0, 2, 1))                 # back to (N, 256, L)


def resblock_ref(x_ncl, params, dilation):
    """Pure-JAX reference mirroring the PyTorch forward (training-mode BN)."""
    prec = jax.lax.Precision.HIGHEST
    dn = ("NCH", "OIH", "NCH")
    y = lax.conv_general_dilated(x_ncl, params["w1"], (1,), "VALID",
                                 rhs_dilation=(dilation,), dimension_numbers=dn,
                                 precision=prec)
    y = y + params["b1"][None, :, None]
    a1 = params["a1"][None, :, None]
    y = jnp.where(y >= 0, y, a1 * y)
    mu = jnp.mean(y, axis=(0, 2), keepdims=True)
    var = jnp.mean((y - mu) ** 2, axis=(0, 2), keepdims=True)
    y = (y - mu) / jnp.sqrt(var + EPS) * params["g1"][None, :, None] + params["bb1"][None, :, None]
    a2 = params["a2"][None, :, None]
    y = jnp.where(y >= 0, y, a2 * y)
    mu2 = jnp.mean(y, axis=(0, 2), keepdims=True)
    var2 = jnp.mean((y - mu2) ** 2, axis=(0, 2), keepdims=True)
    y = (y - mu2) / jnp.sqrt(var2 + EPS) * params["g2"][None, :, None] + params["bb2"][None, :, None]
    z = lax.conv_general_dilated(y, params["w2"], (1,), "VALID",
                                 dimension_numbers=dn, precision=prec)
    z = z + params["b2"][None, :, None]
    return z + x_ncl


def init_params(key, in_channels=C):
    """Deterministic synthetic parameters, PyTorch weight layouts (O, I, K)."""
    ks = jax.random.split(key, 10)
    p = {}
    p["w1"] = 0.3 * jax.random.normal(ks[0], (C, 1, K), jnp.float32)        # conv1.weight
    p["b1"] = 0.1 * jax.random.normal(ks[1], (C,), jnp.float32)             # conv1.bias
    p["a1"] = 0.25 + 0.05 * jax.random.normal(ks[2], (C,), jnp.float32)     # prelu1.weight
    p["g1"] = 1.0 + 0.1 * jax.random.normal(ks[3], (C,), jnp.float32)       # batch1.weight
    p["bb1"] = 0.1 * jax.random.normal(ks[4], (C,), jnp.float32)            # batch1.bias
    p["a2"] = 0.25 + 0.05 * jax.random.normal(ks[5], (C,), jnp.float32)     # prelu2.weight
    p["g2"] = 1.0 + 0.1 * jax.random.normal(ks[6], (C,), jnp.float32)       # batch2.weight
    p["bb2"] = 0.1 * jax.random.normal(ks[7], (C,), jnp.float32)            # batch2.bias
    p["w2"] = 0.05 * jax.random.normal(ks[8], (C, in_channels, K), jnp.float32)  # conv2.weight
    p["b2"] = 0.1 * jax.random.normal(ks[9], (C,), jnp.float32)             # conv2.bias
    # TODO(synk): `self.conv = nn.Conv1d(256, 1)` in __init__ is invalid (missing
    # kernel_size) and never used in forward(); no parameters created for it.
    return p


if __name__ == "__main__":
    key = jax.random.PRNGKey(0)
    kx, kp = jax.random.split(key)

    dilation = 1
    N, L = 2, 5                       # L = 2*dilation + 3 so the residual add broadcasts
    x = jax.random.normal(kx, (N, 1, L), jnp.float32)
    params = init_params(kp, in_channels=C)   # in_channels must be 256 for conv2 to consume x
    prep = prepare_params(params)             # one-time weight re-layout, hoisted out of forward

    fwd = jax.jit(resblock_forward, static_argnames=("dilation",))
    out = jax.block_until_ready(fwd(x, prep, dilation=dilation))

    ref = resblock_ref(x, params, dilation)
    assert out.shape == (N, C, L), out.shape
    # Tolerance covers bf16 MXU operands vs the HIGHEST-precision f32 reference.
    if not jnp.allclose(out, ref, atol=3e-2, rtol=1e-2):
        max_err = float(jnp.max(jnp.abs(out - ref)))
        raise AssertionError(f"Pallas kernel mismatch vs reference, max abs err = {max_err}")

    print("KERNEL_OK")
</pallas_src>

<mosaic_0001>
module attributes {stable_mosaic.version = 11 : i64} {
  func.func @_resblock_kernel(%arg0: memref<2x5x1xf32, #tpu.memory_space<vmem>>, %arg1: memref<16x256xf32, #tpu.memory_space<vmem>>, %arg2: memref<3x256x256xbf16, #tpu.memory_space<vmem>>, %arg3: memref<2x5x256xf32, #tpu.memory_space<vmem>>) attributes {dimension_semantics = [], scalar_prefetch = 0 : i64, scratch_operands = 0 : i64, tpu.core_type = #tpu.core_type<tc>} {
    %c0 = arith.constant 0 : index
    %c0_0 = arith.constant 0 : index
    %c0_1 = arith.constant 0 : index
    %0 = vector.load %arg0[%c0, %c0_0, %c0_1] : memref<2x5x1xf32, #tpu.memory_space<vmem>>, vector<2x5x1xf32>
    %c0_2 = arith.constant 0 : index
    %c0_3 = arith.constant 0 : index
    %1 = vector.load %arg1[%c0_2, %c0_3] : memref<16x256xf32, #tpu.memory_space<vmem>>, vector<16x256xf32>
    %2 = vector.shape_cast %0 : vector<2x5x1xf32> to vector<2x5x1xf32>
    %3 = vector.broadcast %2 : vector<2x5x1xf32> to vector<2x5x256xf32>
    %4 = vector.extract_strided_slice %3 {offsets = [0, 0, 0], sizes = [2, 3, 256], strides = [1, 1, 1]} : vector<2x5x256xf32> to vector<2x3x256xf32>
    %5 = vector.extract_strided_slice %1 {offsets = [0, 0], sizes = [1, 256], strides = [1, 1]} : vector<16x256xf32> to vector<1x256xf32>
    %6 = vector.shape_cast %5 : vector<1x256xf32> to vector<256xf32>
    %7 = vector.shape_cast %6 : vector<256xf32> to vector<1x1x256xf32>
    %8 = vector.broadcast %7 : vector<1x1x256xf32> to vector<2x3x256xf32>
    %9 = arith.mulf %4, %8 : vector<2x3x256xf32>
    %10 = vector.extract_strided_slice %3 {offsets = [0, 1, 0], sizes = [2, 3, 256], strides = [1, 1, 1]} : vector<2x5x256xf32> to vector<2x3x256xf32>
    %11 = vector.extract_strided_slice %1 {offsets = [1, 0], sizes = [1, 256], strides = [1, 1]} : vector<16x256xf32> to vector<1x256xf32>
    %12 = vector.shape_cast %11 : vector<1x256xf32> to vector<256xf32>
    %13 = vector.shape_cast %12 : vector<256xf32> to vector<1x1x256xf32>
    %14 = vector.broadcast %13 : vector<1x1x256xf32> to vector<2x3x256xf32>
    %15 = arith.mulf %10, %14 : vector<2x3x256xf32>
    %16 = arith.addf %9, %15 : vector<2x3x256xf32>
    %17 = vector.extract_strided_slice %3 {offsets = [0, 2, 0], sizes = [2, 3, 256], strides = [1, 1, 1]} : vector<2x5x256xf32> to vector<2x3x256xf32>
    %18 = vector.extract_strided_slice %1 {offsets = [2, 0], sizes = [1, 256], strides = [1, 1]} : vector<16x256xf32> to vector<1x256xf32>
    %19 = vector.shape_cast %18 : vector<1x256xf32> to vector<256xf32>
    %20 = vector.shape_cast %19 : vector<256xf32> to vector<1x1x256xf32>
    %21 = vector.broadcast %20 : vector<1x1x256xf32> to vector<2x3x256xf32>
    %22 = arith.mulf %17, %21 : vector<2x3x256xf32>
    %23 = arith.addf %16, %22 : vector<2x3x256xf32>
    %24 = vector.extract_strided_slice %1 {offsets = [3, 0], sizes = [1, 256], strides = [1, 1]} : vector<16x256xf32> to vector<1x256xf32>
    %25 = vector.shape_cast %24 : vector<1x256xf32> to vector<256xf32>
    %26 = vector.shape_cast %25 : vector<256xf32> to vector<1x1x256xf32>
    %27 = vector.broadcast %26 : vector<1x1x256xf32> to vector<2x3x256xf32>
    %28 = arith.addf %23, %27 : vector<2x3x256xf32>
    %cst = arith.constant 0.000000e+00 : f32
    %29 = vector.broadcast %cst : f32 to vector<2x3x256xf32>
    %30 = arith.cmpf oge, %28, %29 : vector<2x3x256xf32>
    %31 = vector.extract_strided_slice %1 {offsets = [4, 0], sizes = [1, 256], strides = [1, 1]} : vector<16x256xf32> to vector<1x256xf32>
    %32 = vector.shape_cast %31 : vector<1x256xf32> to vector<256xf32>
    %33 = vector.shape_cast %32 : vector<256xf32> to vector<1x1x256xf32>
    %34 = vector.broadcast %33 : vector<1x1x256xf32> to vector<2x3x256xf32>
    %35 = arith.mulf %34, %28 : vector<2x3x256xf32>
    %36 = arith.select %30, %28, %35 : vector<2x3x256xi1>, vector<2x3x256xf32>
    %cst_4 = arith.constant dense<0.000000e+00> : vector<2x256xf32>
    %37 = vector.multi_reduction <add>, %36, %cst_4 [1] : vector<2x3x256xf32> to vector<2x256xf32>
    %38 = vector.shape_cast %37 : vector<2x256xf32> to vector<2x1x256xf32>
    %cst_5 = arith.constant dense<0.000000e+00> : vector<1x256xf32>
    %39 = vector.multi_reduction <add>, %38, %cst_5 [0] : vector<2x1x256xf32> to vector<1x256xf32>
    %40 = vector.shape_cast %39 : vector<1x256xf32> to vector<1x1x256xf32>
    %41 = arith.mulf %36, %36 : vector<2x3x256xf32>
    %cst_6 = arith.constant dense<0.000000e+00> : vector<2x256xf32>
    %42 = vector.multi_reduction <add>, %41, %cst_6 [1] : vector<2x3x256xf32> to vector<2x256xf32>
    %43 = vector.shape_cast %42 : vector<2x256xf32> to vector<2x1x256xf32>
    %cst_7 = arith.constant dense<0.000000e+00> : vector<1x256xf32>
    %44 = vector.multi_reduction <add>, %43, %cst_7 [0] : vector<2x1x256xf32> to vector<1x256xf32>
    %45 = vector.shape_cast %44 : vector<1x256xf32> to vector<1x1x256xf32>
    %cst_8 = arith.constant 0.166666672 : f32
    %46 = vector.broadcast %cst_8 : f32 to vector<1x1x256xf32>
    %47 = arith.mulf %40, %46 : vector<1x1x256xf32>
    %cst_9 = arith.constant 0.166666672 : f32
    %48 = vector.broadcast %cst_9 : f32 to vector<1x1x256xf32>
    %49 = arith.mulf %45, %48 : vector<1x1x256xf32>
    %50 = arith.mulf %47, %47 : vector<1x1x256xf32>
    %51 = arith.subf %49, %50 : vector<1x1x256xf32>
    %cst_10 = arith.constant 9.99999974E-6 : f32
    %52 = vector.broadcast %cst_10 : f32 to vector<1x1x256xf32>
    %53 = arith.addf %51, %52 : vector<1x1x256xf32>
    %54 = math.rsqrt %53 : vector<1x1x256xf32>
    %55 = vector.extract_strided_slice %1 {offsets = [5, 0], sizes = [1, 256], strides = [1, 1]} : vector<16x256xf32> to vector<1x256xf32>
    %56 = vector.shape_cast %55 : vector<1x256xf32> to vector<256xf32>
    %57 = vector.shape_cast %56 : vector<256xf32> to vector<1x1x256xf32>
    %58 = arith.mulf %54, %57 : vector<1x1x256xf32>
    %59 = vector.broadcast %47 : vector<1x1x256xf32> to vector<2x3x256xf32>
    %60 = arith.subf %36, %59 : vector<2x3x256xf32>
    %61 = vector.broadcast %58 : vector<1x1x256xf32> to vector<2x3x256xf32>
    %62 = arith.mulf %60, %61 : vector<2x3x256xf32>
    %63 = vector.extract_strided_slice %1 {offsets = [6, 0], sizes = [1, 256], strides = [1, 1]} : vector<16x256xf32> to vector<1x256xf32>
    %64 = vector.shape_cast %63 : vector<1x256xf32> to vector<256xf32>
    %65 = vector.shape_cast %64 : vector<256xf32> to vector<1x1x256xf32>
    %66 = vector.broadcast %65 : vector<1x1x256xf32> to vector<2x3x256xf32>
    %67 = arith.addf %62, %66 : vector<2x3x256xf32>
    %cst_11 = arith.constant 0.000000e+00 : f32
    %68 = vector.broadcast %cst_11 : f32 to vector<2x3x256xf32>
    %69 = arith.cmpf oge, %67, %68 : vector<2x3x256xf32>
    %70 = vector.extract_strided_slice %1 {offsets = [7, 0], sizes = [1, 256], strides = [1, 1]} : vector<16x256xf32> to vector<1x256xf32>
    %71 = vector.shape_cast %70 : vector<1x256xf32> to vector<256xf32>
    %72 = vector.shape_cast %71 : vector<256xf32> to vector<1x1x256xf32>
    %73 = vector.broadcast %72 : vector<1x1x256xf32> to vector<2x3x256xf32>
    %74 = arith.mulf %73, %67 : vector<2x3x256xf32>
    %75 = arith.select %69, %67, %74 : vector<2x3x256xi1>, vector<2x3x256xf32>
    %cst_12 = arith.constant dense<0.000000e+00> : vector<2x256xf32>
    %76 = vector.multi_reduction <add>, %75, %cst_12 [1] : vector<2x3x256xf32> to vector<2x256xf32>
    %77 = vector.shape_cast %76 : vector<2x256xf32> to vector<2x1x256xf32>
    %cst_13 = arith.constant dense<0.000000e+00> : vector<1x256xf32>
    %78 = vector.multi_reduction <add>, %77, %cst_13 [0] : vector<2x1x256xf32> to vector<1x256xf32>
    %79 = vector.shape_cast %78 : vector<1x256xf32> to vector<1x1x256xf32>
    %80 = arith.mulf %75, %75 : vector<2x3x256xf32>
    %cst_14 = arith.constant dense<0.000000e+00> : vector<2x256xf32>
    %81 = vector.multi_reduction <add>, %80, %cst_14 [1] : vector<2x3x256xf32> to vector<2x256xf32>
    %82 = vector.shape_cast %81 : vector<2x256xf32> to vector<2x1x256xf32>
    %cst_15 = arith.constant dense<0.000000e+00> : vector<1x256xf32>
    %83 = vector.multi_reduction <add>, %82, %cst_15 [0] : vector<2x1x256xf32> to vector<1x256xf32>
    %84 = vector.shape_cast %83 : vector<1x256xf32> to vector<1x1x256xf32>
    %cst_16 = arith.constant 0.166666672 : f32
    %85 = vector.broadcast %cst_16 : f32 to vector<1x1x256xf32>
    %86 = arith.mulf %79, %85 : vector<1x1x256xf32>
    %cst_17 = arith.constant 0.166666672 : f32
    %87 = vector.broadcast %cst_17 : f32 to vector<1x1x256xf32>
    %88 = arith.mulf %84, %87 : vector<1x1x256xf32>
    %89 = arith.mulf %86, %86 : vector<1x1x256xf32>
    %90 = arith.subf %88, %89 : vector<1x1x256xf32>
    %cst_18 = arith.constant 9.99999974E-6 : f32
    %91 = vector.broadcast %cst_18 : f32 to vector<1x1x256xf32>
    %92 = arith.addf %90, %91 : vector<1x1x256xf32>
    %93 = math.rsqrt %92 : vector<1x1x256xf32>
    %94 = vector.extract_strided_slice %1 {offsets = [8, 0], sizes = [1, 256], strides = [1, 1]} : vector<16x256xf32> to vector<1x256xf32>
    %95 = vector.shape_cast %94 : vector<1x256xf32> to vector<256xf32>
    %96 = vector.shape_cast %95 : vector<256xf32> to vector<1x1x256xf32>
    %97 = arith.mulf %93, %96 : vector<1x1x256xf32>
    %98 = vector.broadcast %86 : vector<1x1x256xf32> to vector<2x3x256xf32>
    %99 = arith.subf %75, %98 : vector<2x3x256xf32>
    %100 = vector.broadcast %97 : vector<1x1x256xf32> to vector<2x3x256xf32>
    %101 = arith.mulf %99, %100 : vector<2x3x256xf32>
    %102 = vector.extract_strided_slice %1 {offsets = [9, 0], sizes = [1, 256], strides = [1, 1]} : vector<16x256xf32> to vector<1x256xf32>
    %103 = vector.shape_cast %102 : vector<1x256xf32> to vector<256xf32>
    %104 = vector.shape_cast %103 : vector<256xf32> to vector<1x1x256xf32>
    %105 = vector.broadcast %104 : vector<1x1x256xf32> to vector<2x3x256xf32>
    %106 = arith.addf %101, %105 : vector<2x3x256xf32>
    %107 = arith.truncf %106 : vector<2x3x256xf32> to vector<2x3x256xbf16>
    %108 = vector.extract_strided_slice %107 {offsets = [0, 0, 0], sizes = [2, 1, 256], strides = [1, 1, 1]} : vector<2x3x256xbf16> to vector<2x1x256xbf16>
    %109 = vector.shape_cast %108 : vector<2x1x256xbf16> to vector<2x256xbf16>
    %c0_19 = arith.constant 0 : index
    %c0_20 = arith.constant 0 : index
    %c0_21 = arith.constant 0 : index
    %110 = vector.load %arg2[%c0_19, %c0_20, %c0_21] : memref<3x256x256xbf16, #tpu.memory_space<vmem>>, vector<1x256x256xbf16>
    %111 = vector.shape_cast %110 : vector<1x256x256xbf16> to vector<256x256xbf16>
    %cst_22 = arith.constant dense<0.000000e+00> : vector<2x256xf32>
    %112 = tpu.matmul %109, %111, %cst_22 {dimension_numbers = #tpu.dot_dimension_numbers<[1], [0], [0], [1], [0, 0, 1, 1], [], []>} : vector<2x256xbf16>, vector<256x256xbf16>, vector<2x256xf32> -> vector<2x256xf32>
    %113 = vector.extract_strided_slice %107 {offsets = [0, 1, 0], sizes = [2, 1, 256], strides = [1, 1, 1]} : vector<2x3x256xbf16> to vector<2x1x256xbf16>
    %114 = vector.shape_cast %113 : vector<2x1x256xbf16> to vector<2x256xbf16>
    %c1 = arith.constant 1 : index
    %c0_23 = arith.constant 0 : index
    %c0_24 = arith.constant 0 : index
    %115 = vector.load %arg2[%c1, %c0_23, %c0_24] : memref<3x256x256xbf16, #tpu.memory_space<vmem>>, vector<1x256x256xbf16>
    %116 = vector.shape_cast %115 : vector<1x256x256xbf16> to vector<256x256xbf16>
    %cst_25 = arith.constant dense<0.000000e+00> : vector<2x256xf32>
    %117 = tpu.matmul %114, %116, %cst_25 {dimension_numbers = #tpu.dot_dimension_numbers<[1], [0], [0], [1], [0, 0, 1, 1], [], []>} : vector<2x256xbf16>, vector<256x256xbf16>, vector<2x256xf32> -> vector<2x256xf32>
    %118 = arith.addf %112, %117 : vector<2x256xf32>
    %119 = vector.extract_strided_slice %107 {offsets = [0, 2, 0], sizes = [2, 1, 256], strides = [1, 1, 1]} : vector<2x3x256xbf16> to vector<2x1x256xbf16>
    %120 = vector.shape_cast %119 : vector<2x1x256xbf16> to vector<2x256xbf16>
    %c2 = arith.constant 2 : index
    %c0_26 = arith.constant 0 : index
    %c0_27 = arith.constant 0 : index
    %121 = vector.load %arg2[%c2, %c0_26, %c0_27] : memref<3x256x256xbf16, #tpu.memory_space<vmem>>, vector<1x256x256xbf16>
    %122 = vector.shape_cast %121 : vector<1x256x256xbf16> to vector<256x256xbf16>
    %cst_28 = arith.constant dense<0.000000e+00> : vector<2x256xf32>
    %123 = tpu.matmul %120, %122, %cst_28 {dimension_numbers = #tpu.dot_dimension_numbers<[1], [0], [0], [1], [0, 0, 1, 1], [], []>} : vector<2x256xbf16>, vector<256x256xbf16>, vector<2x256xf32> -> vector<2x256xf32>
    %124 = arith.addf %118, %123 : vector<2x256xf32>
    %125 = vector.extract_strided_slice %1 {offsets = [10, 0], sizes = [1, 256], strides = [1, 1]} : vector<16x256xf32> to vector<1x256xf32>
    %126 = vector.shape_cast %125 : vector<1x256xf32> to vector<256xf32>
    %127 = vector.shape_cast %126 : vector<256xf32> to vector<1x256xf32>
    %128 = vector.broadcast %127 : vector<1x256xf32> to vector<2x256xf32>
    %129 = arith.addf %124, %128 : vector<2x256xf32>
    %130 = vector.shape_cast %129 : vector<2x256xf32> to vector<2x1x256xf32>
    %131 = vector.broadcast %130 : vector<2x1x256xf32> to vector<2x5x256xf32>
    %132 = arith.addf %131, %3 : vector<2x5x256xf32>
    %c0_29 = arith.constant 0 : index
    %c0_30 = arith.constant 0 : index
    %c0_31 = arith.constant 0 : index
    %133 = vector.load %arg3[%c0_29, %c0_30, %c0_31] : memref<2x5x256xf32, #tpu.memory_space<vmem>>, vector<2x5x256xf32>
    tpu.vector_store %arg3[%c0_29, %c0_30, %c0_31], %132 {strides = array<i32>} : memref<2x5x256xf32, #tpu.memory_space<vmem>>, vector<2x5x256xf32>,
    return
  }
}

</mosaic_0001>

<bundles_post_ra>
// kernel: resblock_forward.1
= control target key start
LH: loop header
LB: loop body
LE: loop exit
PB: predicated region body
PF: predicated region fallthrough
CT: control target
= control target key end

     0   :  { %8 = vsyncpa [#allocation3], 0  ;;  %s2013_s0 = inlined_call_operand.vmem [shape: f32[2,5,1], index: 0, kind: input, shape index: {}]   ;;  %s2014_s1 = inlined_call_operand.hbm [shape: f32[16,256], index: 1, kind: input, shape index: {}]   ;;  %s2015_s2 = inlined_call_operand.hbm [shape: bf16[3,256,256], index: 2, kind: input, shape index: {}]   ;;  %s2016_s3 = inlined_call_operand.vmem [shape: f32[2,5,256], index: 3, kind: output, shape index: {}]  }
   0x1   :  { %s16_s14 = sshll.u32 %s2014_s1, 4  ;;  %s17_s14 = int_to_ptr.hbm [resolvable:$true] %s16_s14 }
   0x2   :  { %9 = vsyncpa [#allocation5], 0  ;;  %s1735_s15 = smov [#allocation2]   ;;  %s29_s19 = sshll.u32 %s2015_s2, 4  ;;  %s30_s19 = int_to_ptr.hbm [resolvable:$true] %s29_s19 }
   0x3   :  { %s18_s16 = sshll.u32 %s1735_s15, 4  ;;  %s1736_s20 = smov 256   ;;  %s19_s16 = int_to_ptr.vmem [resolvable:$true] %s18_s16 }
   0x4   :  { %s1737_s21 = smov 16   ;;  %s1738_s22 = smov [#allocation4]  }
   0x5   :  { %24 = dma.hbm_to_vmem [thread:$0]  %s17_s14, 512, %s19_s16, [#allocation3], %s1736_s20, %s1736_s20, %s1737_s21  }
   0x6   :  { %s31_s23 = sshll.u32 %s1738_s22, 4  ;;  %s1739_s24 = smov 128   ;;  %s32_s23 = int_to_ptr.vmem [resolvable:$true] %s31_s23 }
   0x7   :  { %s1740_s25 = smov 8  }
   0x8   :  { %37 = dma.hbm_to_vmem [thread:$0]  %s30_s19, 12288, %s32_s23, [#allocation5], %s1739_s24, %s1739_s24, %s1740_s25  }
   0x9   :  { %1731 = dma.done.wait [#allocation3], 512  }
   0xa   :  { %1732 = vsyncadd [#allocation3], 4294966784 }
   0xb   :  { %1733 = dma.done.wait [#allocation5], 12288  }
   0xc   :  { %1734 = vsyncadd [#allocation5], 4294955008  ;;  %v1741_v0 = vmov 0   ;;  %v46_v1 = vld [vmem:[%s2013_s0] sm:$0x1f]  ;;  %v1776_v4 = vld [vmem:[#allocation2 + $0x8] sm:$0xff] }
   0xd   :  { %1674 = vset.pattern.permute.xlu0 %v1741_v0  ;;  %v47_v2 = vld [vmem:[%s2013_s0 + $0x8] sm:$0x1f]  ;;  %v1774_v3 = vld [vmem:[#allocation2] sm:$0xff]  ;;  %v69_v6 = vperm.slane %v1776_v4, 1  ;;  %v91_v8 = vperm.slane %v1776_v4, 2  ;;  %v63_v10 = vperm.slane %v1776_v4, 0 }
   0xe   :  { %54 = vperm.xlu0 %1674, %v46_v1   ;;  %v68_v5 = vperm.slane %v1774_v3, 1  ;;  %v90_v7 = vperm.slane %v1774_v3, 2  ;;  %v62_v9 = vperm.slane %v1774_v3, 0  ;;  %v112_v20 = vperm.slane %v1774_v3, 3  ;;  %v1245_v40 = vld [vmem:[#allocation4 + $0x170] sm:$0xf] }
   0xf   :  { %v113_v21 = vperm.slane %v1776_v4, 3  ;;  %v122_v28 = vperm.slane %v1774_v3, 4  ;;  %v123_v29 = vperm.slane %v1776_v4, 4  ;;  %vm132_vm0 = vcmask 1042432   ;;  %v1618_v41 = vld [vmem:[#allocation4 + $0x174] sm:$0xf0] }
  0x10   :  { %v1309_v46 = vld [vmem:[#allocation4 + $0x1f0] sm:$0xf]  ;;  %v1246_v50 = vor.u32 %v1618_v41, %v1245_v40  ;;  %v1634_v51 = vld [vmem:[#allocation4 + $0x1f4] sm:$0xf0]  ;;  %v1617_v52 = vld [vmem:[#allocation4 + $0x174] sm:$0xf] }
  0x11   :  { %v1247_v53 = vld [vmem:[#allocation4 + $0x178] sm:$0xf0]  ;;  %v1633_v62 = vld [vmem:[#allocation4 + $0x1f4] sm:$0xf] }
  0x12   :  { %621 = vmatpush.bf16.msra.mxu0 %v1246_v50  ;;  %v1311_v63 = vld [vmem:[#allocation4 + $0x1f8] sm:$0xf0]  ;;  %v1629_v41 = vld [vmem:[#allocation4 + $0x1d4] sm:$0xf]  ;;  %v1612_v50 = vld [vmem:[#allocation4 + $0x144] sm:$0xf0] }
  0x13   :  { %v1231_v40 = vld [vmem:[#allocation4 + $0x158] sm:$0xf0] }
  0x16   :  { %59 = vperm.xlu0 %1674, %v47_v2   ;;  %v1310_v2 = vor.u32 %v1634_v51, %v1309_v46  ;;  %v1295_v46 = vld [vmem:[#allocation4 + $0x1d8] sm:$0xf0]  ;;  %v1285_v51 = vld [vmem:[#allocation4 + $0x1c0] sm:$0xf] }
  0x18   :  { %634 = vmatpush.bf16.msra.mxu1 %v1310_v2  ;;  %v1213_v2 = vld [vmem:[#allocation4 + $0x130] sm:$0xf] }
  0x80   :  { %v1784_v11 = vpop.permute.xlu0 %54 }
  0x81   :  { %v70_v12 = vmul.f32 %v68_v5, %v1784_v11  ;;  %v71_v13 = vmul.f32 %v69_v6, %v1784_v11  ;;  %v92_v14 = vmul.f32 %v90_v7, %v1784_v11  ;;  %v93_v15 = vmul.f32 %v91_v8, %v1784_v11 }
  0x82   :  { %v64_v16 = vmul.f32 %v62_v9, %v1784_v11  ;;  %v65_v17 = vmul.f32 %v63_v10, %v1784_v11 }
  0x83   :  { %v78_v18 = vrot.slane %v70_v12, 1  ;;  %v79_v19 = vrot.slane %v71_v13, 1  ;;  %v100_v24 = vrot.slane %v92_v14, 2  ;;  %v101_v25 = vrot.slane %v93_v15, 2  ;;  %v1301_v12 = vld [vmem:[#allocation4 + $0x1e0] sm:$0xf] }
  0x84   :  { %v1632_v13 = vld [vmem:[#allocation4 + $0x1e4] sm:$0xf0] }
  0x85   :  { %v86_v22 = vadd.f32 %v78_v18, %v64_v16  ;;  %v87_v23 = vadd.f32 %v79_v19, %v65_v17  ;;  %v1314_v17 = vor.u32 %v1633_v62, %v1311_v63  ;;  %v1298_v62 = vor.u32 %v1629_v41, %v1295_v46  ;;  %v1287_v63 = vld [vmem:[#allocation4 + $0x1c8] sm:$0xf0]  ;;  %v1607_v41 = vld [vmem:[#allocation4 + $0x124] sm:$0xf] }
  0x86   :  { %v1271_v46 = vld [vmem:[#allocation4 + $0x1a8] sm:$0xf0] }
  0x87   :  { %v108_v26 = vadd.f32 %v100_v24, %v86_v22  ;;  %v109_v27 = vadd.f32 %v101_v25, %v87_v23  ;;  %v1615_v22 = vld [vmem:[#allocation4 + $0x164] sm:$0xf]  ;;  %v1239_v23 = vld [vmem:[#allocation4 + $0x168] sm:$0xf0]  ;;  %660 = vmatpush.bf16.msra.mxu3 %v1314_v17  ;;  %v1626_v17 = vld [vmem:[#allocation4 + $0x1b4] sm:$0xf0] }
  0x88   :  { %v1796_v30 = vpop.permute.xlu0 %59 }
  0x89   :  { %v114_v31 = vadd.f32 %v112_v20, %v108_v26  ;;  %v115_v32 = vadd.f32 %v113_v21, %v109_v27  ;;  %v66_v33 = vmul.f32 %v62_v9, %v1796_v30  ;;  %v72_v34 = vmul.f32 %v68_v5, %v1796_v30 }
  0x8a   :  { %v73_v35 = vmul.f32 %v69_v6, %v1796_v30  ;;  %v94_v36 = vmul.f32 %v90_v7, %v1796_v30  ;;  %v95_v37 = vmul.f32 %v91_v8, %v1796_v30  ;;  %v67_v49 = vmul.f32 %v63_v10, %v1796_v30  ;;  %v1237_v6 = vld [vmem:[#allocation4 + $0x160] sm:$0xf]  ;;  %v1616_v7 = vld [vmem:[#allocation4 + $0x164] sm:$0xf0] }
  0x8b   :  { %vm118_vm1 = vcmp.ge.f32.partialorder %v114_v31, 0.0  ;;  %vm119_vm2 = vcmp.ge.f32.partialorder %v115_v32, 0.0  ;;  %v124_v38 = vmul.f32 %v122_v28, %v114_v31  ;;  %v125_v39 = vmul.f32 %v123_v29, %v115_v32 }
  0x8c   :  { %v80_v42 = vrot.slane %v72_v34, 1  ;;  %v81_v43 = vrot.slane %v73_v35, 1  ;;  %v102_v44 = vrot.slane %v94_v36, 2  ;;  %v103_v45 = vrot.slane %v95_v37, 2  ;;  %v1614_v34 = vld [vmem:[#allocation4 + $0x154] sm:$0xf0] }
  0x8d   :  { %v1811_v47 = vsel %vm118_vm1, %v114_v31, %v124_v38  ;;  %v1813_v48 = vsel %vm119_vm2, %v115_v32, %v125_v39  ;;  %v1250_v5 = vor.u32 %v1617_v52, %v1247_v53  ;;  %v1238_v26 = vor.u32 %v1616_v7, %v1237_v6  ;;  %v1631_v31 = vld [vmem:[#allocation4 + $0x1e4] sm:$0xf]  ;;  %v1303_v32 = vld [vmem:[#allocation4 + $0x1e8] sm:$0xf0]  ;;  %v1293_v35 = vld [vmem:[#allocation4 + $0x1d0] sm:$0xf] }
  0x8e   :  { %v133_v54 = vsel %vm132_vm0, %v1811_v47, 0.0  ;;  %v140_v55 = vsel %vm132_vm0, %v1813_v48, 0.0  ;;  %v163_v56 = vmul.f32 %v1811_v47, %v1811_v47  ;;  %v164_v57 = vmul.f32 %v1813_v48, %v1813_v48  ;;  %v1630_v36 = vld [vmem:[#allocation4 + $0x1d4] sm:$0xf0]  ;;  %v1613_v39 = vld [vmem:[#allocation4 + $0x154] sm:$0xf] }
  0x8f   :  { %v134_v58 = vrot.slane %v133_v54, 4  ;;  %v141_v59 = vrot.slane %v140_v55, 4  ;;  %v88_v60 = vadd.f32 %v80_v42, %v66_v33  ;;  %v89_v61 = vadd.f32 %v81_v43, %v67_v49  ;;  %647 = vmatpush.bf16.msra.mxu2 %v1250_v5  ;;  %v1229_v33 = vld [vmem:[#allocation4 + $0x150] sm:$0xf]  ;;  %622 = vmatpush.bf16.msra.mxu0 %v1238_v26  ;;  %v1221_v49 = vld [vmem:[#allocation4 + $0x140] sm:$0xf] }
  0x90   :  { %v167_v0 = vsel %vm132_vm0, %v163_v56, 0.0  ;;  %v1826_v1 = vsel %vm132_vm0, %v164_v57, 0.0  ;;  %v1302_v27 = vor.u32 %v1632_v13, %v1301_v12  ;;  %v1306_v38 = vor.u32 %v1631_v31, %v1303_v32  ;;  %v1628_v52 = vld [vmem:[#allocation4 + $0x1c4] sm:$0xf0]  ;;  %v1611_v56 = vld [vmem:[#allocation4 + $0x144] sm:$0xf] }
  0x91   :  { %v1828_v8 = vadd.f32 %v134_v58, %v133_v54  ;;  %v1830_v9 = vadd.f32 %v141_v59, %v140_v55  ;;  %v168_v10 = vrot.slane %v167_v0, 4  ;;  %v175_v14 = vrot.slane %v1826_v1, 4  ;;  %v1223_v57 = vld [vmem:[#allocation4 + $0x148] sm:$0xf0]  ;;  %v1627_v58 = vld [vmem:[#allocation4 + $0x1c4] sm:$0xf] }
  0x92   :  { %v110_v15 = vadd.f32 %v102_v44, %v88_v60  ;;  %v111_v16 = vadd.f32 %v103_v45, %v89_v61  ;;  %635 = vmatpush.bf16.msra.mxu1 %v1302_v27  ;;  %v1230_v44 = vor.u32 %v1614_v34, %v1229_v33  ;;  %v1294_v45 = vor.u32 %v1630_v36, %v1293_v35  ;;  %v1610_v7 = vld [vmem:[#allocation4 + $0x134] sm:$0xf0]  ;;  %v1625_v26 = vld [vmem:[#allocation4 + $0x1b4] sm:$0xf]  ;;  %v1205_v33 = vld [vmem:[#allocation4 + $0x120] sm:$0xf] }
  0x93   :  { %v136_v18 = vrot.slane %v1828_v8, 2  ;;  %v143_v19 = vrot.slane %v1830_v9, 2  ;;  %661 = vmatpush.bf16.msra.mxu3 %v1306_v38  ;;  %v1851_v53 = vadd.f32 %v168_v10, %v167_v0  ;;  %v1234_v61 = vor.u32 %v1613_v39, %v1231_v40  ;;  %v1277_v10 = vld [vmem:[#allocation4 + $0x1b0] sm:$0xf]  ;;  %v1608_v36 = vld [vmem:[#allocation4 + $0x124] sm:$0xf0] }
  0x94   :  { %v116_v24 = vadd.f32 %v112_v20, %v110_v15  ;;  %v117_v25 = vadd.f32 %v113_v21, %v111_v16  ;;  %v1242_v21 = vor.u32 %v1615_v22, %v1239_v23  ;;  %623 = vmatpush.bf16.msra.mxu0 %v1230_v44  ;;  %v1858_v0 = vadd.f32 %v175_v14, %v1826_v1  ;;  %v1609_v22 = vld [vmem:[#allocation4 + $0x134] sm:$0xf]  ;;  %v1279_v1 = vld [vmem:[#allocation4 + $0x1b8] sm:$0xf0]  ;;  %v1207_v44 = vld [vmem:[#allocation4 + $0x128] sm:$0xf0] }
  0x95   :  { %v1222_v15 = vor.u32 %v1612_v50, %v1221_v49  ;;  %v1286_v16 = vor.u32 %v1628_v52, %v1285_v51  ;;  %v1226_v23 = vor.u32 %v1611_v56, %v1223_v57  ;;  %v170_v14 = vrot.slane %v1851_v53, 2  ;;  %v1197_v51 = vld [vmem:[#allocation4 + $0x110] sm:$0xf]  ;;  %v1606_v52 = vld [vmem:[#allocation4 + $0x114] sm:$0xf0] }
  0x96   :  { %vm120_vm3 = vcmp.ge.f32.partialorder %v116_v24, 0.0  ;;  %vm121_vm4 = vcmp.ge.f32.partialorder %v117_v25, 0.0  ;;  %v126_v37 = vmul.f32 %v122_v28, %v116_v24  ;;  %v127_v20 = vmul.f32 %v123_v29, %v117_v25  ;;  %648 = vmatpush.bf16.msra.mxu2 %v1242_v21  ;;  %636 = vmatpush.bf16.msra.mxu1 %v1294_v45  ;;  %v1623_v45 = vld [vmem:[#allocation4 + $0x1a4] sm:$0xf] }
  0x97   :  { %662 = vmatpush.bf16.msra.mxu3 %v1298_v62  ;;  %v1214_v32 = vor.u32 %v1610_v7, %v1213_v2  ;;  %v1278_v35 = vor.u32 %v1626_v17, %v1277_v10  ;;  %v177_v21 = vrot.slane %v1858_v0, 2  ;;  %v1282_v40 = vor.u32 %v1625_v26, %v1279_v1  ;;  %v1621_v62 = vld [vmem:[#allocation4 + $0x194] sm:$0xf]  ;;  %v1189_v2 = vld [vmem:[#allocation4 + $0x100] sm:$0xf] }
  0x98   :  { %v1843_v42 = vsel %vm120_vm3, %v116_v24, %v126_v37  ;;  %v1845_v43 = vsel %vm121_vm4, %v117_v25, %v127_v20  ;;  %v1290_v24 = vor.u32 %v1627_v58, %v1287_v63  ;;  %v1215_v25 = vld [vmem:[#allocation4 + $0x138] sm:$0xf0]  ;;  %624 = vmatpush.bf16.msra.mxu0 %v1222_v15  ;;  %v1269_v37 = vld [vmem:[#allocation4 + $0x1a0] sm:$0xf]  ;;  %v1624_v20 = vld [vmem:[#allocation4 + $0x1a4] sm:$0xf0]  ;;  %v1210_v58 = vor.u32 %v1607_v41, %v1207_v44 }
  0x99   :  { %v147_v28 = vsel %vm132_vm0, %v1843_v42, 0.0  ;;  %v154_v29 = vsel %vm132_vm0, %v1845_v43, 0.0  ;;  %v165_v54 = vmul.f32 %v1843_v42, %v1843_v42  ;;  %v166_v55 = vmul.f32 %v1845_v43, %v1845_v43  ;;  %v1263_v63 = vld [vmem:[#allocation4 + $0x198] sm:$0xf0]  ;;  %v1604_v7 = vld [vmem:[#allocation4 + $0x104] sm:$0xf0] }
  0x9a   :  { %v148_v59 = vrot.slane %v147_v28, 4  ;;  %v155_v60 = vrot.slane %v154_v29, 4  ;;  %649 = vmatpush.bf16.msra.mxu2 %v1234_v61  ;;  %637 = vmatpush.bf16.msra.mxu1 %v1286_v16  ;;  %v1218_v39 = vor.u32 %v1609_v22, %v1215_v25  ;;  %v1199_v61 = vld [vmem:[#allocation4 + $0x118] sm:$0xf0]  ;;  %v1253_v10 = vld [vmem:[#allocation4 + $0x180] sm:$0xf]  ;;  %v1266_v22 = vor.u32 %v1621_v62, %v1263_v63 }
  0x9b   :  { %v181_v5 = vsel %vm132_vm0, %v165_v54, 0.0  ;;  %v188_v6 = vsel %vm132_vm0, %v166_v55, 0.0  ;;  %663 = vmatpush.bf16.msra.mxu3 %v1290_v24  ;;  %v1261_v54 = vld [vmem:[#allocation4 + $0x190] sm:$0xf]  ;;  %v1622_v55 = vld [vmem:[#allocation4 + $0x194] sm:$0xf0]  ;;  %v1874_v26 = vadd.f32 %v170_v14, %v1851_v53  ;;  %v178_v53 = vadd.f32 %v177_v21, %v1858_v0 }
  0x9c   :  { %v182_v12 = vrot.slane %v181_v5, 4  ;;  %v189_v13 = vrot.slane %v188_v6, 4  ;;  %v1863_v27 = vadd.f32 %v148_v59, %v147_v28  ;;  %v1865_v31 = vadd.f32 %v155_v60, %v154_v29  ;;  %625 = vmatpush.bf16.msra.mxu0 %v1214_v32  ;;  %v1605_v60 = vld [vmem:[#allocation4 + $0x114] sm:$0xf]  ;;  %v1191_v15 = vld [vmem:[#allocation4 + $0x108] sm:$0xf0] }
  0x9d   :  { %v1206_v28 = vor.u32 %v1608_v36, %v1205_v33  ;;  %v1270_v29 = vor.u32 %v1624_v20, %v1269_v37  ;;  %v1274_v59 = vor.u32 %v1623_v45, %v1271_v46  ;;  %v1373_v16 = vld [vmem:[#allocation4 + $0x70] sm:$0xf]  ;;  %v1202_v17 = vor.u32 %v1605_v60, %v1199_v61  ;;  %v1602_v25 = vld [vmem:[#allocation4 + $0xf4] sm:$0xf0]  ;;  %v1619_v1 = vld [vmem:[#allocation4 + $0x184] sm:$0xf] }
  0x9e   :  { %v1867_v34 = vadd.f32 %v182_v12, %v181_v5  ;;  %v190_v38 = vadd.f32 %v189_v13, %v188_v6  ;;  %650 = vmatpush.bf16.msra.mxu2 %v1226_v23  ;;  %v150_v49 = vrot.slane %v1863_v27, 2  ;;  %v157_v50 = vrot.slane %v1865_v31, 2  ;;  %638 = vmatpush.bf16.msra.mxu1 %v1278_v35  ;;  %v1620_v12 = vld [vmem:[#allocation4 + $0x184] sm:$0xf0]  ;;  %v1603_v13 = vld [vmem:[#allocation4 + $0x104] sm:$0xf] }
  0x9f   :  { %664 = vmatpush.bf16.msra.mxu3 %v1282_v40  ;;  %v1198_v5 = vor.u32 %v1606_v52, %v1197_v51  ;;  %v1262_v6 = vor.u32 %v1622_v55, %v1261_v54  ;;  %v1586_v23 = vld [vmem:[#allocation4 + $0x74] sm:$0xf0]  ;;  %v1437_v24 = vld [vmem:[#allocation4 + $0xf0] sm:$0xf]  ;;  %v1255_v32 = vld [vmem:[#allocation4 + $0x188] sm:$0xf0]  ;;  %v1190_v35 = vor.u32 %v1604_v7, %v1189_v2  ;;  %v1254_v36 = vor.u32 %v1620_v12, %v1253_v10 }
  0xa0   :  { %v184_v56 = vrot.slane %v1867_v34, 2  ;;  %v191_v57 = vrot.slane %v190_v38, 2  ;;  %626 = vmatpush.bf16.msra.mxu0 %v1206_v28  ;;  %v1585_v33 = vld [vmem:[#allocation4 + $0x74] sm:$0xf]  ;;  %v1375_v37 = vld [vmem:[#allocation4 + $0x78] sm:$0xf0]  ;;  %v1374_v44 = vor.u32 %v1586_v23, %v1373_v16  ;;  %v1438_v45 = vor.u32 %v1602_v25, %v1437_v24 }
  0xa1   :  { %v1601_v20 = vld [vmem:[#allocation4 + $0xf4] sm:$0xf]  ;;  %v1365_v46 = vld [vmem:[#allocation4 + $0x60] sm:$0xf]  ;;  %v1194_v14 = vor.u32 %v1603_v13, %v1191_v15  ;;  %v1258_v28 = vor.u32 %v1619_v1, %v1255_v32  ;;  %v1600_v52 = vld [vmem:[#allocation4 + $0xe4] sm:$0xf0]  ;;  %v158_v0 = vadd.f32 %v157_v50, %v1865_v31  ;;  %v137_v24 = vadd.f32 %v136_v18, %v1828_v8 }
  0xa2   :  { %651 = vmatpush.bf16.msra.mxu2 %v1218_v39  ;;  %639 = vmatpush.bf16.msra.mxu1 %v1270_v29  ;;  %v1439_v39 = vld [vmem:[#allocation4 + $0xf8] sm:$0xf0]  ;;  %v185_v40 = vadd.f32 %v184_v56, %v1867_v34  ;;  %v192_v41 = vadd.f32 %v191_v57, %v190_v38  ;;  %v1584_v29 = vld [vmem:[#allocation4 + $0x64] sm:$0xf0]  ;;  %v1429_v51 = vld [vmem:[#allocation4 + $0xe0] sm:$0xf]  ;;  %v151_v34 = vadd.f32 %v150_v49, %v1863_v27 }
  0xa3   :  { %665 = vmatpush.bf16.msra.mxu3 %v1274_v59  ;;  %v172_v54 = vrot.slane %v1874_v26, 1  ;;  %v1378_v38 = vor.u32 %v1585_v33, %v1375_v37  ;;  %v1442_v55 = vor.u32 %v1601_v20, %v1439_v39  ;;  %v1583_v56 = vld [vmem:[#allocation4 + $0x64] sm:$0xf]  ;;  %v1367_v21 = vld [vmem:[#allocation4 + $0x68] sm:$0xf0]  ;;  %v1366_v61 = vor.u32 %v1584_v29, %v1365_v46 }
  0xa4   :  { %627 = vmatpush.bf16.msra.mxu0 %v1198_v5  ;;  %v1599_v57 = vld [vmem:[#allocation4 + $0xe4] sm:$0xf]  ;;  %v186_v59 = vrot.slane %v185_v40, 1  ;;  %v193_v60 = vrot.slane %v192_v41, 1  ;;  %v1430_v62 = vor.u32 %v1600_v52, %v1429_v51  ;;  %v1357_v63 = vld [vmem:[#allocation4 + $0x50] sm:$0xf]  ;;  %v1370_v31 = vor.u32 %v1583_v56, %v1367_v21 }
  0xa5   :  { %v1582_v27 = vld [vmem:[#allocation4 + $0x54] sm:$0xf0]  ;;  %v1421_v49 = vld [vmem:[#allocation4 + $0xd0] sm:$0xf]  ;;  %v179_v5 = vrot.slane %v178_v53, 1  ;;  %v159_v15 = vrot.slane %v158_v0, 1  ;;  %v144_v25 = vadd.f32 %v143_v19, %v1830_v9 }
  0xa6   :  { %652 = vmatpush.bf16.msra.mxu2 %v1210_v58  ;;  %640 = vmatpush.bf16.msra.mxu1 %v1262_v6  ;;  %v1431_v58 = vld [vmem:[#allocation4 + $0xe8] sm:$0xf0]  ;;  %v1598_v2 = vld [vmem:[#allocation4 + $0xd4] sm:$0xf0]  ;;  %v152_v6 = vrot.slane %v151_v34, 1  ;;  %v187_v16 = vadd.f32 %v186_v59, %v185_v40  ;;  %v194_v1 = vadd.f32 %v193_v60, %v192_v41 }
  0xa7   :  { %666 = vmatpush.bf16.msra.mxu3 %v1266_v22  ;;  %v1434_v50 = vor.u32 %v1599_v57, %v1431_v58  ;;  %v1581_v7 = vld [vmem:[#allocation4 + $0x54] sm:$0xf]  ;;  %v1359_v10 = vld [vmem:[#allocation4 + $0x58] sm:$0xf0]  ;;  %v1422_v22 = vor.u32 %v1598_v2, %v1421_v49  ;;  %v1349_v23 = vld [vmem:[#allocation4 + $0x40] sm:$0xf]  ;;  %v180_v40 = vadd.f32 %v179_v5, %v178_v53 }
  0xa8   :  { %628 = vmatpush.bf16.msra.mxu0 %v1190_v35  ;;  %v1597_v12 = vld [vmem:[#allocation4 + $0xd4] sm:$0xf]  ;;  %v1423_v13 = vld [vmem:[#allocation4 + $0xd8] sm:$0xf0]  ;;  %v1580_v32 = vld [vmem:[#allocation4 + $0x44] sm:$0xf0]  ;;  %v1362_v37 = vor.u32 %v1581_v7, %v1359_v10 }
  0xa9   :  { %v1413_v33 = vld [vmem:[#allocation4 + $0xc0] sm:$0xf]  ;;  %v1596_v35 = vld [vmem:[#allocation4 + $0xc4] sm:$0xf0]  ;;  %v1426_v20 = vor.u32 %v1597_v12, %v1423_v13  ;;  %v1579_v39 = vld [vmem:[#allocation4 + $0x44] sm:$0xf]  ;;  %v1350_v18 = vor.u32 %v1580_v32, %v1349_v23  ;;  %v196_v29 = vadd.f32 %v194_v1, %v180_v40 }
  0xaa   :  { %653 = vmatpush.bf16.msra.mxu2 %v1202_v17  ;;  %641 = vmatpush.bf16.msra.mxu1 %v1254_v36  ;;  %v1358_v17 = vor.u32 %v1582_v27, %v1357_v63  ;;  %v173_v36 = vadd.f32 %v172_v54, %v1874_v26  ;;  %v1415_v46 = vld [vmem:[#allocation4 + $0xc8] sm:$0xf0]  ;;  %v1414_v9 = vor.u32 %v1596_v35, %v1413_v33  ;;  %v1341_v19 = vld [vmem:[#allocation4 + $0x30] sm:$0xf]  ;;  %v1578_v41 = vld [vmem:[#allocation4 + $0x34] sm:$0xf0] }
  0xab   :  { %667 = vmatpush.bf16.msra.mxu3 %v1258_v28  ;;  %v160_v28 = vadd.f32 %v159_v15, %v158_v0  ;;  %v1405_v26 = vld [vmem:[#allocation4 + $0xb0] sm:$0xf]  ;;  %v1594_v51 = vld [vmem:[#allocation4 + $0xb4] sm:$0xf0]  ;;  %v1577_v53 = vld [vmem:[#allocation4 + $0x34] sm:$0xf]  ;;  %v1342_v21 = vor.u32 %v1578_v41, %v1341_v19 }
  0xac   :  { %841 = vmatpush.bf16.msrb.mxu0 %v1374_v44  ;;  %v1351_v44 = vld [vmem:[#allocation4 + $0x48] sm:$0xf0]  ;;  %v195_v8 = vadd.f32 %v187_v16, %v173_v36  ;;  %v145_v56 = vrot.slane %v144_v25, 1  ;;  %v1593_v57 = vld [vmem:[#allocation4 + $0xb4] sm:$0xf]  ;;  %v1406_v60 = vor.u32 %v1594_v51, %v1405_v26 }
  0xad   :  { %v1354_v52 = vor.u32 %v1579_v39, %v1351_v44  ;;  %v1407_v58 = vld [vmem:[#allocation4 + $0xb8] sm:$0xf0]  ;;  %v1576_v63 = vld [vmem:[#allocation4 + $0x24] sm:$0xf0]  ;;  %v1397_v27 = vld [vmem:[#allocation4 + $0xa0] sm:$0xf] }
  0xae   :  { %854 = vmatpush.bf16.msrb.mxu1 %v1438_v45  ;;  %654 = vmatpush.bf16.msra.mxu2 %v1194_v14  ;;  %v1595_v45 = vld [vmem:[#allocation4 + $0xc4] sm:$0xf]  ;;  %v153_v14 = vadd.f32 %v152_v6, %v151_v34  ;;  %v199_v59 = vmul.f32 0.16666667, %v195_v8  ;;  %v1333_v34 = vld [vmem:[#allocation4 + $0x20] sm:$0xf]  ;;  %v1410_v5 = vor.u32 %v1593_v57, %v1407_v58 }
  0xaf   :  { %880 = vmatpush.bf16.msrb.mxu3 %v1442_v55  ;;  %v1418_v54 = vor.u32 %v1595_v45, %v1415_v46  ;;  %v138_v55 = vrot.slane %v137_v24, 1  ;;  %v1592_v49 = vld [vmem:[#allocation4 + $0xa4] sm:$0xf0]  ;;  %v200_v2 = vmul.f32 0.16666667, %v196_v29  ;;  %v1334_v15 = vor.u32 %v1576_v63, %v1333_v34 }
  0xb0   :  { %842 = vmatpush.bf16.msrb.mxu0 %v1366_v61  ;;  %v146_v61 = vadd.f32 %v145_v56, %v144_v25  ;;  %v1575_v6 = vld [vmem:[#allocation4 + $0x24] sm:$0xf]  ;;  %v1399_v12 = vld [vmem:[#allocation4 + $0xa8] sm:$0xf0]  ;;  %v1325_v13 = vld [vmem:[#allocation4 + $0x10] sm:$0xf]  ;;  %v1398_v16 = vor.u32 %v1592_v49, %v1397_v27 }
  0xb1   :  { %v139_v0 = vadd.f32 %v138_v55, %v137_v24  ;;  %v1591_v10 = vld [vmem:[#allocation4 + $0xa4] sm:$0xf]  ;;  %v1389_v25 = vld [vmem:[#allocation4 + $0x90] sm:$0xf]  ;;  %v1590_v1 = vld [vmem:[#allocation4 + $0x94] sm:$0xf0] }
  0xb2   :  { %867 = vmatpush.bf16.msrb.mxu2 %v1378_v38  ;;  %855 = vmatpush.bf16.msrb.mxu1 %v1430_v62  ;;  %v1343_v38 = vld [vmem:[#allocation4 + $0x38] sm:$0xf0]  ;;  %v162_v7 = vadd.f32 %v160_v28, %v146_v61  ;;  %v1402_v32 = vor.u32 %v1591_v10, %v1399_v12  ;;  %v1573_v33 = vld [vmem:[#allocation4 + $0x14] sm:$0xf]  ;;  %v1390_v44 = vor.u32 %v1590_v1, %v1389_v25  ;;  %v239_v61 = vperm.slane %v1774_v3, 6 }
  0xb3   :  { %881 = vmatpush.bf16.msrb.mxu3 %v1434_v50  ;;  %v1346_v62 = vor.u32 %v1577_v53, %v1343_v38  ;;  %v161_v50 = vadd.f32 %v153_v14, %v139_v0  ;;  %v1589_v39 = vld [vmem:[#allocation4 + $0x94] sm:$0xf]  ;;  %v1391_v40 = vld [vmem:[#allocation4 + $0x98] sm:$0xf0]  ;;  %v240_v49 = vperm.slane %v1776_v4, 6 }
  0xb4   :  { %843 = vmatpush.bf16.msrb.mxu0 %v1358_v17  ;;  %v1574_v17 = vld [vmem:[#allocation4 + $0x14] sm:$0xf0]  ;;  %v1896_v23 = vmul.f32 0.16666667, %v162_v7 }
  0xb6   :  { %868 = vmatpush.bf16.msrb.mxu2 %v1370_v31  ;;  %856 = vmatpush.bf16.msrb.mxu1 %v1422_v22  ;;  %v1335_v31 = vld [vmem:[#allocation4 + $0x28] sm:$0xf0]  ;;  %v1894_v22 = vmul.f32 0.16666667, %v161_v50  ;;  %v202_v36 = vmul.f32 %v1896_v23, %v1896_v23  ;;  %v232_v63 = vsub.f32 %v1845_v43, %v1896_v23 }
  0xb7   :  { %882 = vmatpush.bf16.msrb.mxu3 %v1426_v20  ;;  %v1338_v24 = vor.u32 %v1575_v6, %v1335_v31  ;;  %v1327_v20 = vld [vmem:[#allocation4 + $0x18] sm:$0xf0]  ;;  %v249_v6 = vperm.slane %v1774_v3, 7 }
  0xb8   :  { %844 = vmatpush.bf16.msrb.mxu0 %v1350_v18  ;;  %v201_v35 = vmul.f32 %v1894_v22, %v1894_v22  ;;  %v204_v46 = vsub.f32 %v200_v2, %v202_v36  ;;  %v1330_v8 = vor.u32 %v1573_v33, %v1327_v20  ;;  %v1394_v18 = vor.u32 %v1589_v39, %v1391_v40 }
  0xb9   :  { %v231_v34 = vsub.f32 %v1843_v42, %v1894_v22  ;;  %v250_v42 = vperm.slane %v1776_v4, 7 }
  0xba   :  { %869 = vmatpush.bf16.msrb.mxu2 %v1362_v37  ;;  %857 = vmatpush.bf16.msrb.mxu1 %v1414_v9  ;;  %v1326_v37 = vor.u32 %v1574_v17, %v1325_v13  ;;  %v203_v45 = vsub.f32 %v199_v59, %v201_v35  ;;  %v206_v19 = vadd.f32 1e-05, %v204_v46 }
  0xbb   :  { %883 = vmatpush.bf16.msrb.mxu3 %v1418_v54 }
  0xbc   :  { %845 = vmatpush.bf16.msrb.mxu0 %v1342_v21  ;;  %v205_v9 = vadd.f32 1e-05, %v203_v45  ;;  %vm223_vm9 = vweird.f32 %v206_v19 }
  0xbe   :  { %870 = vmatpush.bf16.msrb.mxu2 %v1354_v52  ;;  %858 = vmatpush.bf16.msrb.mxu1 %v1406_v60  ;;  %1675 = vrsqrt.f32 %v205_v9  ;;  %vm213_vm7 = vweird.f32 %v205_v9  ;;  %v229_v60 = vsub.f32 %v1811_v47, %v1894_v22 }
  0xbf   :  { %884 = vmatpush.bf16.msrb.mxu3 %v1410_v5  ;;  %1677 = vrsqrt.f32 %v206_v19 }
  0xc0   :  { %846 = vmatpush.bf16.msrb.mxu0 %v1334_v15 }
  0xc2   :  { %871 = vmatpush.bf16.msrb.mxu2 %v1346_v62  ;;  %859 = vmatpush.bf16.msrb.mxu1 %v1398_v16  ;;  %v230_v62 = vsub.f32 %v1813_v48, %v1896_v23 }
  0xc3   :  { %885 = vmatpush.bf16.msrb.mxu3 %v1402_v32 }
  0xc4   :  { %847 = vmatpush.bf16.msrb.mxu0 %v1326_v37  ;;  %v1676_v41 = vpop.eup %1675 }
  0xc5   :  { %v1678_v14 = vpop.eup %1677  ;;  %v208_v28 = vmul.f32 %v1676_v41, %v205_v9  ;;  %vm214_vm5 = vweird.f32 %v1676_v41 }
  0xc6   :  { %872 = vmatpush.bf16.msrb.mxu2 %v1338_v24  ;;  %860 = vmatpush.bf16.msrb.mxu1 %v1390_v44  ;;  %v218_v29 = vmul.f32 %v1678_v14, %v206_v19  ;;  %vm224_vm6 = vweird.f32 %v1678_v14  ;;  %vm215_vm8 = vmor %vm213_vm7, %vm214_vm5  ;;  %vm453_vm5 = vcmask 1041409  }
  0xc7   :  { %886 = vmatpush.bf16.msrb.mxu3 %v1394_v18  ;;  %v209_v26 = vmul.f32 %v1676_v41, %v208_v28  ;;  %vm225_vm10 = vmor %vm223_vm9, %vm224_vm6  ;;  %vm1157_vm6 = vcmask 1040384  }
  0xc8   :  { %v219_v51 = vmul.f32 %v1678_v14, %v218_v29 }
  0xc9   :  { %v210_v52 = vmul.f32 0.5, %v209_v26 }
  0xca   :  { %873 = vmatpush.bf16.msrb.mxu2 %v1330_v8  ;;  %v220_v54 = vmul.f32 0.5, %v219_v51 }
  0xcb   :  { %v211_v53 = vsub.f32 1.5, %v210_v52 }
  0xcc   :  { %v221_v38 = vsub.f32 1.5, %v220_v54 }
  0xcd   :  { %v212_v55 = vmul.f32 %v1676_v41, %v211_v53 }
  0xce   :  { %v222_v56 = vmul.f32 %v1678_v14, %v221_v38 }
  0xcf   :  { %v216_v21 = vsel %vm215_vm8, %v1676_v41, %v212_v55 }
  0xd0   :  { %v226_v57 = vsel %vm225_vm10, %v1678_v14, %v222_v56  ;;  %v227_v58 = vmul.f32 %v216_v21, %v1774_v3 }
  0xd1   :  { %v228_v59 = vmul.f32 %v226_v57, %v1776_v4 }
  0xd2   :  { %v233_v0 = vperm.slane %v227_v58, 5 }
  0xd3   :  { %v234_v27 = vperm.slane %v228_v59, 5 }
  0xd4   :  { %v235_v2 = vmul.f32 %v233_v0, %v229_v60  ;;  %v237_v5 = vmul.f32 %v233_v0, %v231_v34 }
  0xd5   :  { %v236_v47 = vmul.f32 %v234_v27, %v230_v62  ;;  %v238_v31 = vmul.f32 %v234_v27, %v232_v63 }
  0xd6   :  { %v241_v50 = vadd.f32 %v239_v61, %v235_v2  ;;  %v243_v7 = vadd.f32 %v239_v61, %v237_v5 }
  0xd7   :  { %v242_v10 = vadd.f32 %v240_v49, %v236_v47  ;;  %v244_v12 = vadd.f32 %v240_v49, %v238_v31 }
  0xd8   :  { %vm245_vm11 = vcmp.ge.f32.partialorder %v241_v50, 0.0  ;;  %vm247_vm12 = vcmp.ge.f32.partialorder %v243_v7, 0.0  ;;  %v251_v48 = vmul.f32 %v249_v6, %v241_v50  ;;  %v253_v13 = vmul.f32 %v249_v6, %v243_v7 }
  0xd9   :  { %vm246_vm13 = vcmp.ge.f32.partialorder %v242_v10, 0.0  ;;  %vm248_vm14 = vcmp.ge.f32.partialorder %v244_v12, 0.0  ;;  %v252_v43 = vmul.f32 %v250_v42, %v242_v10  ;;  %v254_v15 = vmul.f32 %v250_v42, %v244_v12 }
  0xda   :  { %v1916_v16 = vsel %vm245_vm11, %v241_v50, %v251_v48  ;;  %v1918_v17 = vsel %vm247_vm12, %v243_v7, %v253_v13 }
  0xdb   :  { %v1920_v3 = vsel %vm246_vm13, %v242_v10, %v252_v43  ;;  %v1922_v22 = vsel %vm248_vm14, %v244_v12, %v254_v15  ;;  %v259_v4 = vsel %vm132_vm0, %v1916_v16, 0.0  ;;  %v273_v23 = vsel %vm132_vm0, %v1918_v17, 0.0 }
  0xdc   :  { %v260_v24 = vrot.slane %v259_v4, 4  ;;  %v266_v25 = vsel %vm132_vm0, %v1920_v3, 0.0  ;;  %v274_v1 = vrot.slane %v273_v23, 4  ;;  %v280_v32 = vsel %vm132_vm0, %v1922_v22, 0.0 }
  0xdd   :  { %v267_v33 = vrot.slane %v266_v25, 4  ;;  %v281_v35 = vrot.slane %v280_v32, 4  ;;  %v289_v36 = vmul.f32 %v1916_v16, %v1916_v16  ;;  %v290_v37 = vmul.f32 %v1920_v3, %v1920_v3 }
  0xde   :  { %v261_v20 = vadd.f32 %v260_v24, %v259_v4  ;;  %v275_v39 = vadd.f32 %v274_v1, %v273_v23  ;;  %v291_v40 = vmul.f32 %v1918_v17, %v1918_v17  ;;  %v292_v44 = vmul.f32 %v1922_v22, %v1922_v22 }
  0xdf   :  { %v268_v45 = vadd.f32 %v267_v33, %v266_v25  ;;  %v282_v46 = vadd.f32 %v281_v35, %v280_v32  ;;  %v293_v8 = vsel %vm132_vm0, %v289_v36, 0.0  ;;  %v300_v18 = vsel %vm132_vm0, %v290_v37, 0.0 }
  0xe0   :  { %v262_v9 = vrot.slane %v261_v20, 2  ;;  %v276_v19 = vrot.slane %v275_v39, 2  ;;  %v294_v41 = vrot.slane %v293_v8, 4  ;;  %v301_v14 = vrot.slane %v300_v18, 4 }
  0xe1   :  { %v269_v28 = vrot.slane %v268_v45, 2  ;;  %v283_v29 = vrot.slane %v282_v46, 2  ;;  %v307_v26 = vsel %vm132_vm0, %v291_v40, 0.0  ;;  %v314_v51 = vsel %vm132_vm0, %v292_v44, 0.0 }
  0xe2   :  { %v263_v52 = vadd.f32 %v262_v9, %v261_v20  ;;  %v277_v54 = vadd.f32 %v276_v19, %v275_v39  ;;  %v295_v53 = vadd.f32 %v294_v41, %v293_v8  ;;  %v302_v38 = vadd.f32 %v301_v14, %v300_v18  ;;  %v1317_v8 = vld [vmem:[#allocation4] sm:$0xf]  ;;  %v1572_v18 = vld [vmem:[#allocation4 + $0x4] sm:$0xf0] }
  0xe3   :  { %v270_v55 = vadd.f32 %v269_v28, %v268_v45  ;;  %v284_v56 = vadd.f32 %v283_v29, %v282_v46  ;;  %v308_v21 = vrot.slane %v307_v26, 4  ;;  %v315_v57 = vrot.slane %v314_v51, 4  ;;  %v1381_v9 = vld [vmem:[#allocation4 + $0x80] sm:$0xf]  ;;  %v1588_v14 = vld [vmem:[#allocation4 + $0x84] sm:$0xf0] }
  0xe4   :  { %v264_v58 = vrot.slane %v263_v52, 1  ;;  %v278_v59 = vrot.slane %v277_v54, 1  ;;  %v296_v60 = vrot.slane %v295_v53, 2  ;;  %v303_v34 = vrot.slane %v302_v38, 2  ;;  %v1571_v28 = vld [vmem:[#allocation4 + $0x4] sm:$0xf] }
  0xe5   :  { %v271_v0 = vrot.slane %v270_v55, 1  ;;  %v285_v61 = vrot.slane %v284_v56, 1  ;;  %v309_v62 = vadd.f32 %v308_v21, %v307_v26  ;;  %v316_v63 = vadd.f32 %v315_v57, %v314_v51  ;;  %v1319_v29 = vld [vmem:[#allocation4 + $0x8] sm:$0xf0] }
  0xe6   :  { %v265_v27 = vadd.f32 %v264_v58, %v263_v52  ;;  %v279_v49 = vadd.f32 %v278_v59, %v277_v54  ;;  %v297_v2 = vadd.f32 %v296_v60, %v295_v53  ;;  %v304_v5 = vadd.f32 %v303_v34, %v302_v38  ;;  %v1587_v53 = vld [vmem:[#allocation4 + $0x84] sm:$0xf]  ;;  %v1383_v38 = vld [vmem:[#allocation4 + $0x88] sm:$0xf0] }
  0xe7   :  { %v272_v6 = vadd.f32 %v271_v0, %v270_v55  ;;  %v286_v47 = vadd.f32 %v285_v61, %v284_v56  ;;  %v310_v31 = vrot.slane %v309_v62, 2  ;;  %v317_v42 = vrot.slane %v316_v63, 2  ;;  %v1952_v0 = vld [vmem:[#allocation2 + $0x10] sm:$0xff] }
  0xe8   :  { %v287_v50 = vadd.f32 %v279_v49, %v265_v27  ;;  %v298_v7 = vrot.slane %v297_v2, 1  ;;  %v305_v10 = vrot.slane %v304_v5, 1  ;;  %v1318_v41 = vor.u32 %v1572_v18, %v1317_v8  ;;  %v1649_v8 = vld [vmem:[#allocation4 + $0x274] sm:$0xf]  ;;  %v1503_v18 = vld [vmem:[#allocation4 + $0x278] sm:$0xf0] }
  0xe9   :  { %v288_v12 = vadd.f32 %v286_v47, %v272_v6  ;;  %v311_v48 = vadd.f32 %v310_v31, %v309_v62  ;;  %v318_v13 = vadd.f32 %v317_v42, %v316_v63  ;;  %v1382_v52 = vor.u32 %v1588_v14, %v1381_v9  ;;  %v1954_v62 = vld [vmem:[#allocation2 + $0x18] sm:$0xff]  ;;  %v1665_v9 = vld [vmem:[#allocation4 + $0x2f4] sm:$0xf] }
  0xea   :  { %v299_v43 = vadd.f32 %v298_v7, %v297_v2  ;;  %v306_v15 = vadd.f32 %v305_v10, %v304_v5  ;;  %v1944_v24 = vmul.f32 0.16666667, %v287_v50  ;;  %v1322_v54 = vor.u32 %v1571_v28, %v1319_v29  ;;  %848 = vmatpush.bf16.msrb.mxu0 %v1318_v41 }
  0xeb   :  { %v312_v4 = vrot.slane %v311_v48, 1  ;;  %v319_v23 = vrot.slane %v318_v13, 1  ;;  %v1946_v25 = vmul.f32 0.16666667, %v288_v12  ;;  %v1386_v56 = vor.u32 %v1587_v53, %v1383_v38  ;;  %861 = vmatpush.bf16.msrb.mxu1 %v1382_v52  ;;  %v1493_v52 = vld [vmem:[#allocation4 + $0x260] sm:$0xf] }
  0xec   :  { %v327_v36 = vmul.f32 %v1944_v24, %v1944_v24  ;;  %874 = vmatpush.bf16.msrb.mxu2 %v1322_v54  ;;  %v355_v6 = vsub.f32 %v1916_v16, %v1944_v24  ;;  %v357_v47 = vsub.f32 %v1918_v17, %v1944_v24  ;;  %v365_v42 = vperm.slane %v1952_v0, 1  ;;  %v1648_v54 = vld [vmem:[#allocation4 + $0x264] sm:$0xf0] }
  0xed   :  { %v313_v1 = vadd.f32 %v312_v4, %v311_v48  ;;  %v320_v32 = vadd.f32 %v319_v23, %v318_v13  ;;  %v328_v37 = vmul.f32 %v1946_v25, %v1946_v25  ;;  %887 = vmatpush.bf16.msrb.mxu3 %v1386_v56  ;;  %v356_v50 = vsub.f32 %v1920_v3, %v1946_v25  ;;  %v1664_v56 = vld [vmem:[#allocation4 + $0x2e4] sm:$0xf0] }
  0xee   :  { %v358_v7 = vsub.f32 %v1922_v22, %v1946_v25  ;;  %v366_v12 = vperm.slane %v1954_v62, 1  ;;  %v1501_v25 = vld [vmem:[#allocation4 + $0x270] sm:$0xf]  ;;  %v1506_v53 = vor.u32 %v1649_v8, %v1503_v18  ;;  %v1641_v8 = vld [vmem:[#allocation4 + $0x234] sm:$0xf] }
  0xef   :  { %v321_v33 = vadd.f32 %v313_v1, %v299_v43  ;;  %v322_v35 = vadd.f32 %v320_v32, %v306_v15  ;;  %v1471_v18 = vld [vmem:[#allocation4 + $0x238] sm:$0xf0] }
  0xf1   :  { %v325_v20 = vmul.f32 0.16666667, %v321_v33  ;;  %v326_v39 = vmul.f32 0.16666667, %v322_v35 }
  0xf3   :  { %v329_v40 = vsub.f32 %v325_v20, %v327_v36  ;;  %v330_v44 = vsub.f32 %v326_v39, %v328_v37  ;;  %v1650_v37 = vld [vmem:[#allocation4 + $0x274] sm:$0xf0]  ;;  %v1565_v20 = vld [vmem:[#allocation4 + $0x2f0] sm:$0xf] }
  0xf5   :  { %v331_v45 = vadd.f32 1e-05, %v329_v40  ;;  %v332_v46 = vadd.f32 1e-05, %v330_v44 }
  0xf7   :  { %1679 = vrsqrt.f32 %v331_v45  ;;  %vm339_vm1 = vweird.f32 %v331_v45  ;;  %vm349_vm3 = vweird.f32 %v332_v46 }
  0xf8   :  { %1681 = vrsqrt.f32 %v332_v46 }
  0xfd   :  { %v1680_v19 = vpop.eup %1679 }
  0xfe   :  { %v1682_v26 = vpop.eup %1681  ;;  %v334_v51 = vmul.f32 %v1680_v19, %v331_v45  ;;  %vm340_vm15 = vweird.f32 %v1680_v19 }
  0xff   :  { %v344_v55 = vmul.f32 %v1682_v26, %v332_v46  ;;  %vm350_vm0 = vweird.f32 %v1682_v26  ;;  %vm341_vm2 = vmor %vm339_vm1, %vm340_vm15  ;;  %v1666_v46 = vld [vmem:[#allocation4 + $0x2f4] sm:$0xf0] }
 0x100   :  { %v335_v21 = vmul.f32 %v1680_v19, %v334_v51  ;;  %vm351_vm4 = vmor %vm349_vm3, %vm350_vm0  ;;  %v1566_v51 = vor.u32 %v1666_v46, %v1565_v20  ;;  %v1658_v46 = vld [vmem:[#allocation4 + $0x2b4] sm:$0xf0] }
 0x101   :  { %v345_v57 = vmul.f32 %v1682_v26, %v344_v55  ;;  %v1557_v55 = vld [vmem:[#allocation4 + $0x2e0] sm:$0xf] }
 0x102   :  { %v336_v58 = vmul.f32 0.5, %v335_v21  ;;  %v1647_v21 = vld [vmem:[#allocation4 + $0x264] sm:$0xf] }
 0x103   :  { %v346_v59 = vmul.f32 0.5, %v345_v57  ;;  %v1495_v57 = vld [vmem:[#allocation4 + $0x268] sm:$0xf0] }
 0x104   :  { %v337_v60 = vsub.f32 1.5, %v336_v58  ;;  %v1663_v58 = vld [vmem:[#allocation4 + $0x2e4] sm:$0xf] }
 0x105   :  { %v347_v34 = vsub.f32 1.5, %v346_v59  ;;  %v1559_v59 = vld [vmem:[#allocation4 + $0x2e8] sm:$0xf0] }
 0x106   :  { %v338_v61 = vmul.f32 %v1680_v19, %v337_v60  ;;  %v1494_v60 = vor.u32 %v1648_v54, %v1493_v52  ;;  %v1474_v52 = vor.u32 %v1641_v8, %v1471_v18 }
 0x107   :  { %v348_v63 = vmul.f32 %v1682_v26, %v347_v34  ;;  %v1558_v34 = vor.u32 %v1664_v56, %v1557_v55  ;;  %v1639_v55 = vld [vmem:[#allocation4 + $0x224] sm:$0xf]  ;;  %v1463_v56 = vld [vmem:[#allocation4 + $0x228] sm:$0xf0] }
 0x108   :  { %v342_v27 = vsel %vm341_vm2, %v1680_v19, %v338_v61  ;;  %v1567_v19 = vld [vmem:[#allocation4 + $0x2f8] sm:$0xf0]  ;;  %v1485_v61 = vld [vmem:[#allocation4 + $0x250] sm:$0xf] }
 0x109   :  { %v352_v49 = vsel %vm351_vm4, %v1682_v26, %v348_v63  ;;  %v353_v2 = vmul.f32 %v342_v27, %v1952_v0  ;;  %v1502_v26 = vor.u32 %v1650_v37, %v1501_v25  ;;  %v1570_v38 = vor.u32 %v1665_v9, %v1567_v19  ;;  %v1646_v63 = vld [vmem:[#allocation4 + $0x254] sm:$0xf0]  ;;  %v1657_v9 = vld [vmem:[#allocation4 + $0x2b4] sm:$0xf]  ;;  %v1535_v19 = vld [vmem:[#allocation4 + $0x2b8] sm:$0xf0] }
 0x10a   :  { %v354_v5 = vmul.f32 %v352_v49, %v1954_v62  ;;  %v1498_v27 = vor.u32 %v1647_v21, %v1495_v57  ;;  %v1562_v49 = vor.u32 %v1663_v58, %v1559_v59  ;;  %v1642_v25 = vld [vmem:[#allocation4 + $0x234] sm:$0xf0]  ;;  %v1538_v54 = vor.u32 %v1657_v9, %v1535_v19  ;;  %v1655_v21 = vld [vmem:[#allocation4 + $0x2a4] sm:$0xf]  ;;  %v1527_v57 = vld [vmem:[#allocation4 + $0x2a8] sm:$0xf0] }
 0x10b   :  { %v359_v31 = vperm.slane %v353_v2, 0  ;;  %v1549_v2 = vld [vmem:[#allocation4 + $0x2d0] sm:$0xf] }
 0x10c   :  { %v360_v10 = vperm.slane %v354_v5, 0  ;;  %v1662_v5 = vld [vmem:[#allocation4 + $0x2d4] sm:$0xf0] }
 0x10d   :  { %v361_v48 = vmul.f32 %v359_v31, %v355_v6  ;;  %v363_v13 = vmul.f32 %v359_v31, %v357_v47  ;;  %v1645_v6 = vld [vmem:[#allocation4 + $0x254] sm:$0xf]  ;;  %v1487_v47 = vld [vmem:[#allocation4 + $0x258] sm:$0xf0] }
 0x10e   :  { %v362_v43 = vmul.f32 %v360_v10, %v356_v50  ;;  %v364_v15 = vmul.f32 %v360_v10, %v358_v7  ;;  %v1661_v31 = vld [vmem:[#allocation4 + $0x2d4] sm:$0xf]  ;;  %v1477_v50 = vld [vmem:[#allocation4 + $0x240] sm:$0xf]  ;;  %v1486_v7 = vor.u32 %v1646_v63, %v1485_v61  ;;  %v1550_v10 = vor.u32 %v1662_v5, %v1549_v2  ;;  %v1455_v5 = vld [vmem:[#allocation4 + $0x218] sm:$0xf0] }
 0x10f   :  { %v367_v16 = vadd.f32 %v365_v42, %v361_v48  ;;  %v369_v4 = vadd.f32 %v365_v42, %v363_v13  ;;  %v1551_v42 = vld [vmem:[#allocation4 + $0x2d8] sm:$0xf0]  ;;  %v1541_v48 = vld [vmem:[#allocation4 + $0x2c0] sm:$0xf]  ;;  %v1660_v13 = vld [vmem:[#allocation4 + $0x2c4] sm:$0xf0]  ;;  %v1466_v61 = vor.u32 %v1639_v55, %v1463_v56  ;;  %v1530_v63 = vor.u32 %v1655_v21, %v1527_v57 }
 0x110   :  { %v368_v23 = vadd.f32 %v366_v12, %v362_v43  ;;  %v370_v17 = vadd.f32 %v366_v12, %v364_v15  ;;  %v1644_v12 = vld [vmem:[#allocation4 + $0x244] sm:$0xf0]  ;;  %v1490_v43 = vor.u32 %v1645_v6, %v1487_v47  ;;  %v1554_v15 = vor.u32 %v1661_v31, %v1551_v42  ;;  %v1637_v2 = vld [vmem:[#allocation4 + $0x214] sm:$0xf]  ;;  %v1519_v47 = vld [vmem:[#allocation4 + $0x298] sm:$0xf0] }
 0x111   :  { %v1653_v6 = vld [vmem:[#allocation4 + $0x294] sm:$0xf] }
 0x112   :  { %v371_v24 = vpack.c.bf16 %v368_v23, %v367_v16  ;;  %v372_v1 = vpack.c.bf16 %v370_v17, %v369_v4  ;;  %v1643_v16 = vld [vmem:[#allocation4 + $0x244] sm:$0xf]  ;;  %v1479_v4 = vld [vmem:[#allocation4 + $0x248] sm:$0xf0] }
 0x114   :  { %v440_v32 = vunpack.c.l.b16 %v371_v24  ;;  %v442_v33 = vunpack.c.l.b16 %v372_v1  ;;  %v441_v35 = vunpack.c.h.b16 %v371_v24  ;;  %v443_v3 = vunpack.c.h.b16 %v372_v1  ;;  %v1659_v24 = vld [vmem:[#allocation4 + $0x2c4] sm:$0xf]  ;;  %v1543_v1 = vld [vmem:[#allocation4 + $0x2c8] sm:$0xf0] }
 0x115   :  { %v1546_v37 = vor.u32 %v1659_v24, %v1543_v1 }
 0x116   :  { %v1968_v36 = vunpack.i.l.s16 %v440_v32  ;;  %v1970_v22 = vunpack.i.l.s16 %v441_v35  ;;  %v1972_v39 = vunpack.i.l.s16 %v442_v33  ;;  %v1975_v44 = vunpack.i.l.s16 %v443_v3  ;;  %v1469_v3 = vld [vmem:[#allocation4 + $0x230] sm:$0xf] }
 0x117   :  { %v1478_v32 = vor.u32 %v1644_v12, %v1477_v50  ;;  %v1542_v33 = vor.u32 %v1660_v13, %v1541_v48  ;;  %v1482_v35 = vor.u32 %v1643_v16, %v1479_v4  ;;  %v1636_v12 = vld [vmem:[#allocation4 + $0x204] sm:$0xf0]  ;;  %v1509_v48 = vld [vmem:[#allocation4 + $0x280] sm:$0xf]  ;;  %v1458_v13 = vor.u32 %v1637_v2, %v1455_v5  ;;  %v1635_v16 = vld [vmem:[#allocation4 + $0x204] sm:$0xf] }
 0x118   :  { %v452_v40 = vrot.slane %v1968_v36, 1  ;;  %v455_v45 = vrot.slane %v1970_v22, 1  ;;  %v673_v23 = vrot.slane %v1972_v39, 7  ;;  %v675_v17 = vrot.slane %v1975_v44, 7  ;;  %v1447_v4 = vld [vmem:[#allocation4 + $0x208] sm:$0xf0] }
 0x119   :  { %v927_v31 = vrot.slane %v1972_v39, 1  ;;  %v930_v42 = vrot.slane %v1975_v44, 1  ;;  %v1150_v2 = vperm.slane %v1952_v0, 2 }
 0x11a   :  { %v454_v41 = vsel %vm453_vm5, %v1972_v39, %v452_v40  ;;  %v456_v14 = vsel %vm453_vm5, %v1975_v44, %v455_v45  ;;  %v674_v20 = vsel %vm453_vm5, %v673_v23, %v1968_v36  ;;  %v676_v40 = vsel %vm453_vm5, %v675_v17, %v1970_v22  ;;  %v1533_v45 = vld [vmem:[#allocation4 + $0x2b0] sm:$0xf]  ;;  %v1651_v23 = vld [vmem:[#allocation4 + $0x284] sm:$0xf]  ;;  %v1511_v17 = vld [vmem:[#allocation4 + $0x288] sm:$0xf0] }
 0x11b   :  { %v457_v28 = vpack.c.b16 %v454_v41, %v454_v41  ;;  %v458_v29 = vpack.c.b16 %v456_v14, %v456_v14  ;;  %v1470_v41 = vor.u32 %v1642_v25, %v1469_v3  ;;  %v677_v14 = vpack.c.b16 %v674_v20, %v674_v20 }
 0x11c   :  { %v926_v39 = vrot.slane %v1968_v36, 2  ;;  %v929_v44 = vrot.slane %v1970_v22, 2 }
 0x11d   :  { %629 = vmatmul.bf16.vlgmr.msra.gmra.mxu0 %v457_v28  ;;  %642 = vmatmul.bf16.vlgmr.msra.gmra.mxu1 %v458_v29 }
 0x11e   :  { %655 = vmatmul.bf16.vlgmr.msra.gmra.mxu2 %v457_v28  ;;  %668 = vmatmul.bf16.vlgmr.msra.gmra.mxu3 %v458_v29  ;;  %v678_v28 = vpack.c.b16 %v676_v40, %v676_v40  ;;  %v1534_v29 = vor.u32 %v1658_v46, %v1533_v45  ;;  %v931_v3 = vsel %vm453_vm5, %v930_v42, %v929_v44 }
 0x11f   :  { %1096 = vmatpush.bf16.msra.mxu0 %v1502_v26  ;;  %1109 = vmatpush.bf16.msra.mxu1 %v1566_v51  ;;  %v1461_v26 = vld [vmem:[#allocation4 + $0x220] sm:$0xf]  ;;  %v1640_v51 = vld [vmem:[#allocation4 + $0x224] sm:$0xf0]  ;;  %v933_v36 = vpack.c.b16 %v931_v3, %v931_v3 }
 0x120   :  { %1122 = vmatpush.bf16.msra.mxu2 %v1506_v53  ;;  %1135 = vmatpush.bf16.msra.mxu3 %v1570_v38  ;;  %v1525_v53 = vld [vmem:[#allocation4 + $0x2a0] sm:$0xf]  ;;  %v1656_v38 = vld [vmem:[#allocation4 + $0x2a4] sm:$0xf0]  ;;  %v1462_v58 = vor.u32 %v1640_v51, %v1461_v26 }
 0x121   :  { %v1526_v59 = vor.u32 %v1656_v38, %v1525_v53 }
 0x123   :  { %1097 = vmatpush.bf16.msra.mxu0 %v1494_v60  ;;  %1110 = vmatpush.bf16.msra.mxu1 %v1558_v34  ;;  %v1453_v60 = vld [vmem:[#allocation4 + $0x210] sm:$0xf]  ;;  %v1638_v34 = vld [vmem:[#allocation4 + $0x214] sm:$0xf0] }
 0x124   :  { %1123 = vmatpush.bf16.msra.mxu2 %v1498_v27  ;;  %1136 = vmatpush.bf16.msra.mxu3 %v1562_v49  ;;  %v1517_v27 = vld [vmem:[#allocation4 + $0x290] sm:$0xf]  ;;  %v1654_v49 = vld [vmem:[#allocation4 + $0x294] sm:$0xf0]  ;;  %v1454_v50 = vor.u32 %v1638_v34, %v1453_v60 }
 0x127   :  { %1098 = vmatpush.bf16.msra.mxu0 %v1486_v7  ;;  %1111 = vmatpush.bf16.msra.mxu1 %v1550_v10  ;;  %v1518_v7 = vor.u32 %v1654_v49, %v1517_v27  ;;  %v1445_v10 = vld [vmem:[#allocation4 + $0x200] sm:$0xf] }
 0x128   :  { %1124 = vmatpush.bf16.msra.mxu2 %v1490_v43  ;;  %1137 = vmatpush.bf16.msra.mxu3 %v1554_v15  ;;  %v1522_v43 = vor.u32 %v1653_v6, %v1519_v47  ;;  %v1652_v15 = vld [vmem:[#allocation4 + $0x284] sm:$0xf0]  ;;  %v1446_v24 = vor.u32 %v1636_v12, %v1445_v10 }
 0x129   :  { %v1510_v1 = vor.u32 %v1652_v15, %v1509_v48 }
 0x12b   :  { %1099 = vmatpush.bf16.msra.mxu0 %v1478_v32  ;;  %1112 = vmatpush.bf16.msra.mxu1 %v1542_v33  ;;  %v1450_v32 = vor.u32 %v1635_v16, %v1447_v4  ;;  %v1514_v33 = vor.u32 %v1651_v23, %v1511_v17 }
 0x12c   :  { %1125 = vmatpush.bf16.msra.mxu2 %v1482_v35  ;;  %1138 = vmatpush.bf16.msra.mxu3 %v1546_v37  ;;  %v928_v35 = vsel %vm453_vm5, %v927_v31, %v926_v39 }
 0x12d   :  { %849 = vmatmul.bf16.vlgmr.msrb.gmra.mxu0 %v677_v14  ;;  %862 = vmatmul.bf16.vlgmr.msrb.gmra.mxu1 %v678_v28  ;;  %v932_v25 = vpack.c.b16 %v928_v35, %v928_v35 }
 0x12e   :  { %875 = vmatmul.bf16.vlgmr.msrb.gmra.mxu2 %v677_v14  ;;  %888 = vmatmul.bf16.vlgmr.msrb.gmra.mxu3 %v678_v28 }
 0x12f   :  { %1100 = vmatpush.bf16.msra.mxu0 %v1470_v41  ;;  %1113 = vmatpush.bf16.msra.mxu1 %v1534_v29 }
 0x130   :  { %1126 = vmatpush.bf16.msra.mxu2 %v1474_v52  ;;  %1139 = vmatpush.bf16.msra.mxu3 %v1538_v54 }
 0x133   :  { %1101 = vmatpush.bf16.msra.mxu0 %v1462_v58  ;;  %1114 = vmatpush.bf16.msra.mxu1 %v1526_v59 }
 0x134   :  { %1127 = vmatpush.bf16.msra.mxu2 %v1466_v61  ;;  %1140 = vmatpush.bf16.msra.mxu3 %v1530_v63  ;;  %v1151_v61 = vperm.slane %v1954_v62, 2 }
 0x137   :  { %1102 = vmatpush.bf16.msra.mxu0 %v1454_v50  ;;  %1115 = vmatpush.bf16.msra.mxu1 %v1518_v7 }
 0x138   :  { %1128 = vmatpush.bf16.msra.mxu2 %v1458_v13  ;;  %1141 = vmatpush.bf16.msra.mxu3 %v1522_v43 }
 0x13b   :  { %1103 = vmatpush.bf16.msra.mxu0 %v1446_v24  ;;  %1116 = vmatpush.bf16.msra.mxu1 %v1510_v1 }
 0x13c   :  { %1129 = vmatpush.bf16.msra.mxu2 %v1450_v32  ;;  %1142 = vmatpush.bf16.msra.mxu3 %v1514_v33 }
 0x13e   :  { %1104 = vmatmul.bf16.vlgmr.msra.gmra.mxu0 %v932_v25  ;;  %1117 = vmatmul.bf16.vlgmr.msra.gmra.mxu1 %v933_v36 }
 0x13f   :  { %1130 = vmatmul.bf16.vlgmr.msra.gmra.mxu2 %v932_v25  ;;  %1143 = vmatmul.bf16.vlgmr.msra.gmra.mxu3 %v933_v36 }
 0x19a   :  { %v630_v22 = vpop.f32.mrf.mxu0  ;;  %v643_v37 = vpop.f32.mrf.mxu1 }
 0x19b   :  { %v644_v53 = vadd.f32 %v643_v37, %v630_v22 }
 0x1a1   :  { %v656_v20 = vpop.f32.mrf.mxu2  ;;  %v669_v40 = vpop.f32.mrf.mxu3 }
 0x1a2   :  { %v632_v45 = vpop.f32.mrf.mxu0  ;;  %v645_v46 = vpop.f32.mrf.mxu1  ;;  %v670_v38 = vadd.f32 %v669_v40, %v656_v20 }
 0x1a9   :  { %v658_v8 = vpop.f32.mrf.mxu2  ;;  %v671_v18 = vpop.f32.mrf.mxu3 }
 0x1aa   :  { %v850_v9 = vpop.f32.mrf.mxu0  ;;  %v863_v19 = vpop.f32.mrf.mxu1 }
 0x1ab   :  { %v851_v55 = vadd.f32 %v850_v9, %v644_v53 }
 0x1ad   :  { %v864_v59 = vadd.f32 %v863_v19, %v851_v55 }
 0x1b1   :  { %v876_v41 = vpop.f32.mrf.mxu2  ;;  %v889_v14 = vpop.f32.mrf.mxu3 }
 0x1b2   :  { %v852_v28 = vpop.f32.mrf.mxu0  ;;  %v865_v29 = vpop.f32.mrf.mxu1  ;;  %v877_v56 = vadd.f32 %v876_v41, %v670_v38 }
 0x1b4   :  { %v890_v60 = vadd.f32 %v889_v14, %v877_v56 }
 0x1b9   :  { %v878_v26 = vpop.f32.mrf.mxu2  ;;  %v891_v51 = vpop.f32.mrf.mxu3 }
 0x1bb   :  { %v1105_v52 = vpop.f32.mrf.mxu0  ;;  %v1118_v54 = vpop.f32.mrf.mxu1 }
 0x1bc   :  { %v1119_v21 = vadd.f32 %v1118_v54, %v1105_v52 }
 0x1be   :  { %v1148_v49 = vadd.f32 %v1119_v21, %v864_v59 }
 0x1c0   :  { %v1152_v47 = vadd.f32 %v1150_v2, %v1148_v49 }
 0x1c2   :  { %v1131_v57 = vpop.f32.mrf.mxu2  ;;  %v1144_v58 = vpop.f32.mrf.mxu3 }
 0x1c3   :  { %v1145_v34 = vadd.f32 %v1144_v58, %v1131_v57  ;;  %v1107_v63 = vpop.f32.mrf.mxu0  ;;  %v1120_v27 = vpop.f32.mrf.mxu1 }
 0x1c5   :  { %v1149_v5 = vadd.f32 %v1145_v34, %v890_v60 }
 0x1c7   :  { %v1153_v6 = vadd.f32 %v1151_v61, %v1149_v5 }
 0x1c9   :  { %v1156_v31 = vrot.slane %v1153_v6, 7 }
 0x1ca   :  { %v1133_v42 = vpop.f32.mrf.mxu2  ;;  %v1146_v50 = vpop.f32.mrf.mxu3 }
 0x1cb   :  { %v1158_v7 = vsel %vm1157_vm6, %v1152_v47, %v1156_v31  ;;  %v1159_v10 = vsel %vm453_vm5, %v1152_v47, %v1156_v31 }
 0x1cc   :  { %v1160_v12 = vrot.slane %v1159_v10, 1  ;;  %v1161_v48 = vperm.slane %v1158_v7, 0  ;;  %v1162_v13 = vperm.slane %v1158_v7, 1 }
 0x1ce   :  { %v1163_v43 = vperm.slane %v1160_v12, 0  ;;  %v1164_v62 = vperm.slane %v1160_v12, 1  ;;  %v1169_v15 = vadd.f32 %v1161_v48, %v1784_v11  ;;  %v1170_v16 = vadd.f32 %v1162_v13, %v1784_v11 }
 0x1d0   :  { %v1171_v0 = vadd.f32 %v1163_v43, %v1796_v30  ;;  %v1172_v4 = vadd.f32 %v1164_v62, %v1796_v30  ;;  %1173 = vst [vmem:[%s2016_s3] sm:$0x1f] %v1169_v15 }
 0x1d1   :  { %1174 = vst [vmem:[%s2016_s3 + $0x8] sm:$0x1f] %v1170_v16 }
 0x1d2   :  { %1175 = vst [vmem:[%s2016_s3 + $0x10] sm:$0x1f] %v1171_v0 }
 0x1d3   :  { %1176 = vst [vmem:[%s2016_s3 + $0x18] sm:$0x1f] %v1172_v4 }
 0x1d4   :  { %1181 = vsyncpa [#allocation3], 1 }
 0x1d5   :  { %1182 = vsyncpa [#allocation5], 1 }

</bundles_post_ra>
